<compile_context>
chip_gen: v6e
topology: v6e:2x2x1
jax: 0.10.0
libtpu: 0.0.40
codegen_flags: <defaults>
</compile_context>

<pallas_src>
import functools
import numpy as np
import jax
import jax.numpy as jnp
from jax import lax
from jax.experimental import pallas as pl
from jax.experimental.pallas import tpu as pltpu


def _mrblock_kernel(H, W, C, eps,
                    x_ref, att_ref, mask_ref, wk_ref, wfus1_ref, wdw_ref,
                    bias_ref, o_ref):
    P = H * W
    f32 = jnp.float32
    mxu_dt = wk_ref.dtype            # host-chosen MXU dtype (f32 or bf16)

    xb = x_ref[0]                                     # (C, P) f32

    def mm(w, a):
        # (M, K=C) @ (K=C, P) on the MXU, f32 accumulation.  The activation
        # cast is a no-op in the f32 configuration (review: at small C the
        # kernel is VPU-bound, keep activations f32; at large C weights are
        # pre-cast to bf16 on the host and only the activation is cast here).
        return jnp.dot(w, a.astype(mxu_dt), preferred_element_type=f32)

    def tap(t, kk):
        # 3x3 neighborhood tap kk, zero-padded at image borders: roll the
        # flattened pixel (lane) axis and mask wrapped-around pixels.
        dh, dw = kk // 3 - 1, kk % 3 - 1
        d = dh * W + dw
        if d == 0:
            return t                                  # center tap: identity
        return pltpu.roll(t, shift=(-d) % P, axis=1) * mask_ref[kk]

    # ---- unpack the (24C, 1) f32 bias/LN slab (sublane-aligned slices) ----
    bias = bias_ref[...]
    ln_g, ln_b = bias[0:C], bias[C:2 * C]
    b4 = bias[2 * C:6 * C]
    bdw = bias[6 * C:10 * C]
    bfuse = bias[19 * C:20 * C]
    bfus1 = bias[20 * C:21 * C]
    bfus2 = bias[21 * C:23 * C]
    bfus3 = bias[23 * C:24 * C]

    # ---- LayerNorm2d: normalize over channels (sublanes), per pixel ----
    mu = jnp.mean(xb, axis=0, keepdims=True)          # (1, P)
    dlt = xb - mu
    var = jnp.mean(dlt * dlt, axis=0, keepdims=True)
    inx = ln_g * (dlt * lax.rsqrt(var + eps)) + ln_b  # rsqrt -> EUP slot

    # ---- batched 1x1 convs feeding the four depthwise branches ----
    # wk rows [0:C) AddOp.conv1, [C:2C) MulOp.structure1, [2C:3C) MulOp.color1,
    # rows [3C:4C) ConvOp.conv1
    t4 = mm(wk_ref[0:4 * C], inx) + b4                # (4C, P)

    # ---- the four depthwise 3x3 convs as ONE stacked tap loop ----
    dw4 = tap(t4, 0) * wdw_ref[0] + bdw
    for kk in range(1, 9):
        dw4 = dw4 + tap(t4, kk) * wdw_ref[kk]

    add_x = dw4[0 * C:1 * C]                          # AddOp output
    x_s   = dw4[1 * C:2 * C]                          # MulOp.structure2
    x_c   = dw4[2 * C:3 * C]                          # MulOp.color2
    t_cv  = dw4[3 * C:4 * C]                          # ConvOp.conv2

    # ---- MulOp fuse ----
    mul_x = mm(wk_ref[13 * C:14 * C], x_s * x_c) + bfuse

    # ---- ConvOp KPN: per-pixel 3x3 kernels applied to inx.  Coefficients
    #      are computed per tap (9 small dots) so the live state stays ~C rows
    #      instead of a (9C, P) slab (VMEM/vreg pressure, v7x-friendly). ----
    conv_x = (mm(wk_ref[4 * C:5 * C], t_cv) + bias[10 * C:11 * C]) * tap(inx, 0)
    for kk in range(1, 9):
        coef = (mm(wk_ref[(4 + kk) * C:(5 + kk) * C], t_cv)
                + bias[(10 + kk) * C:(11 + kk) * C])
        conv_x = conv_x + coef * tap(inx, kk)

    # ---- cat([add, mul, conv]); degrad_att folded into wfus1's columns ----
    cat = jnp.concatenate([add_x, mul_x, conv_x], axis=0)        # (3C, P)
    attv = att_ref[0]                                            # (1, 3C) f32
    wfus1s = (wfus1_ref[...] * attv).astype(mxu_dt)              # (C, 3C)
    h1 = mm(wfus1s, cat) + bfus1                                 # (C, P)
    g2 = mm(wk_ref[14 * C:16 * C], h1) + bfus2                   # (2C, P)
    g = g2[0:C] * g2[C:2 * C]                                    # SimpleGate
    out = mm(wk_ref[16 * C:17 * C], g) + bfus3                   # (C, P)

    o_ref[0] = xb + out


def make_params(key, C, H, W, mxu_dtype=None):
    assert C % 8 == 0 and H == W and (H * W) % 128 == 0
    P = H * W
    if mxu_dtype is None:
        # Review: at small C the kernel is VPU/XLU-bound and the MXU is
        # K-starved -> keep a pure f32 path (no activation casts).  For large
        # C switch to bf16 weights (half the weight DMA/VMEM, bf16 MXU path).
        mxu_dtype = jnp.bfloat16 if C >= 64 else jnp.float32

    ks = iter(jax.random.split(key, 32))

    def nrm(shape, scale=0.2):
        return (scale * jax.random.normal(next(ks), shape)).astype(jnp.float32)

    # four branch 1x1 convs (PyTorch (C_out, C_in) layout): add1, s1, c1, k1
    w_add1, b_add1 = nrm((C, C)), nrm((C,))
    w_s1, b_s1 = nrm((C, C)), nrm((C,))
    w_c1, b_c1 = nrm((C, C)), nrm((C,))
    w_k1, b_k1 = nrm((C, C)), nrm((C,))
    w4 = jnp.concatenate([w_add1, w_s1, w_c1, w_k1], axis=0)      # (4C, C)
    b4 = jnp.concatenate([b_add1, b_s1, b_c1, b_k1])              # (4C,)

    # four depthwise 3x3 convs (add.conv2, mul.s2, mul.c2, conv.conv2),
    # stacked on the channel axis, tap-major weights
    def dw_branch():
        return nrm((C, 3, 3)).reshape(C, 9), nrm((C,))
    branches = [dw_branch() for _ in range(4)]
    wdw = jnp.concatenate([w for w, _ in branches], axis=0)       # (4C, 9)
    wdw = wdw.T.reshape(9, 4 * C, 1)                              # (9, 4C, 1)
    bdw = jnp.concatenate([b for _, b in branches])               # (4C,)

    # ConvOp.kernel_conv (C -> (C//4)*9), folded with nearest x4 channel
    # upsample and the KernelConv per-(channel, tap) selection.
    kc = (C // 4) * 9
    w_kc, b_kc = nrm((kc, C)), nrm((kc,))
    sel = np.array([(n * 9 + kk) // 4 for kk in range(9) for n in range(C)],
                   dtype=np.int32)                                # row kk*C + n
    wtap = w_kc[sel]                                              # (9C, C)
    btap = b_kc[sel]                                              # (9C,)

    # MulOp.fuse and fus_op (3C->C, C->2C + SimpleGate, C->C)
    wfuse, bfuse = nrm((C, C)), nrm((C,))
    wfus1, bfus1 = nrm((C, 3 * C)), nrm((C,))
    wfus2, bfus2 = nrm((2 * C, C)), nrm((2 * C,))
    wfus3, bfus3 = nrm((C, C)), nrm((C,))

    # LayerNorm2d params (PyTorch init: weight=1, bias=0)
    ln_g = jnp.ones((C,), jnp.float32)
    ln_b = jnp.zeros((C,), jnp.float32)

    # pack all K=C matmul weights into one MXU slab, host-cast to the MXU dtype
    wk = jnp.concatenate([w4, wtap, wfuse, wfus2, wfus3],
                         axis=0).astype(mxu_dtype)                # (17C, C)
    wfus1 = wfus1.astype(mxu_dtype)                               # (C, 3C)

    # pack all per-row vectors (LN + biases) into one f32 (24C, 1) array
    bias = jnp.concatenate([ln_g, ln_b, b4, bdw, btap,
                            bfuse, bfus1, bfus2, bfus3]).reshape(24 * C, 1)

    # per-tap border masks over the flattened pixel axis (zero padding)
    mask = np.zeros((9, 1, P), np.float32)
    hh = np.repeat(np.arange(H), W)
    ww = np.tile(np.arange(W), H)
    for kk in range(9):
        dh, dw = kk // 3 - 1, kk % 3 - 1
        valid = (hh + dh >= 0) & (hh + dh < H) & (ww + dw >= 0) & (ww + dw < W)
        mask[kk, 0] = valid.astype(np.float32)

    return dict(mask=jnp.asarray(mask), wk=wk, wfus1=wfus1, wdw=wdw, bias=bias)


def mrblock_forward(x_nchw, degrad_att, params, eps=1e-6):
    N, C, H, W = x_nchw.shape
    P = H * W
    # Layout contract (sublane-aligned channel slices, lane-dense stores):
    assert C % 8 == 0, "C must be a multiple of 8 (sublane-aligned slices)"
    assert H == W, "square inputs required (module's interpolate H/W swap)"
    assert P % 128 == 0, "H*W must be a multiple of 128 (lane-dense blocks)"
    assert degrad_att.shape == (N, 3 * C, 1, 1)

    x = x_nchw.reshape(N, C, P)                 # pure reshape, no transpose
    att = degrad_att.reshape(N, 1, 3 * C)       # lane axis = 3C, pure reshape

    kern = functools.partial(_mrblock_kernel, H, W, C, eps)

    def rep(a):                                 # resident, grid-invariant
        nd = a.ndim
        return pl.BlockSpec(a.shape, lambda n, _nd=nd: (0,) * _nd)

    p = params
    weights = [p['mask'], p['wk'], p['wfus1'], p['wdw'], p['bias']]

    out = pl.pallas_call(
        kern,
        out_shape=jax.ShapeDtypeStruct((N, C, P), jnp.float32),
        grid_spec=pltpu.PrefetchScalarGridSpec(
            num_scalar_prefetch=0,
            grid=(N,),
            in_specs=[pl.BlockSpec((1, C, P), lambda n: (n, 0, 0)),
                      pl.BlockSpec((1, 1, 3 * C), lambda n: (n, 0, 0))]
                     + [rep(a) for a in weights],
            out_specs=pl.BlockSpec((1, C, P), lambda n: (n, 0, 0)),
        ),
        compiler_params=pltpu.CompilerParams(
            dimension_semantics=("parallel",),
            # raise the scoped-VMEM cap (v5e default is only 16 MiB) while
            # staying <= physical VMEM on every generation (v7x: 64 MiB).
            vmem_limit_bytes=48 * 1024 * 1024),
    )(x, att, *weights)

    return out.reshape(N, C, H, W)


def mrblock_reference(x_nchw, degrad_att, params, eps=1e-6):
    """Pure-JAX f32 ground truth (explicit zero-padded 2D shifts, un-folded att)."""
    N, C, H, W = x_nchw.shape
    P = H * W
    x = x_nchw.reshape(N, C, P).astype(jnp.float32)
    att = degrad_att.reshape(N, 3 * C, 1)

    wk = params['wk'].astype(jnp.float32)
    wfus1 = params['wfus1'].astype(jnp.float32)
    wdw = params['wdw']
    b = params['bias'][:, 0]
    w4, wtap = wk[0:4 * C], wk[4 * C:13 * C]
    wfuse, wfus2, wfus3 = wk[13 * C:14 * C], wk[14 * C:16 * C], wk[16 * C:17 * C]
    ln_g, ln_b = b[0:C], b[C:2 * C]
    b4, bdw, btap = b[2 * C:6 * C], b[6 * C:10 * C], b[10 * C:19 * C]
    bfuse, bfus1 = b[19 * C:20 * C], b[20 * C:21 * C]
    bfus2, bfus3 = b[21 * C:23 * C], b[23 * C:24 * C]

    def col(v):
        return v.reshape(-1, 1)

    def tap(tf, kk):                                  # tf: (N, R, P)
        R = tf.shape[1]
        dh, dw = kk // 3 - 1, kk % 3 - 1
        t2 = jnp.pad(tf.reshape(N, R, H, W), ((0, 0), (0, 0), (1, 1), (1, 1)))
        return t2[:, :, 1 + dh:1 + dh + H, 1 + dw:1 + dw + W].reshape(N, R, P)

    mu = x.mean(1, keepdims=True)
    d = x - mu
    var = (d * d).mean(1, keepdims=True)
    inx = col(ln_g) * (d / jnp.sqrt(var + eps)) + col(ln_b)

    t4 = jnp.einsum('rc,ncp->nrp', w4, inx) + col(b4)
    dw4 = col(bdw) + sum(tap(t4, kk) * wdw[kk] for kk in range(9))
    add_x, x_s, x_c, t_cv = (dw4[:, i * C:(i + 1) * C] for i in range(4))
    mul_x = jnp.einsum('rc,ncp->nrp', wfuse, x_s * x_c) + col(bfuse)
    coeff = jnp.einsum('rc,ncp->nrp', wtap, t_cv) + col(btap)
    conv_x = sum(coeff[:, kk * C:(kk + 1) * C] * tap(inx, kk) for kk in range(9))
    cat = jnp.concatenate([add_x, mul_x, conv_x], axis=1) * att
    h1 = jnp.einsum('rc,ncp->nrp', wfus1, cat) + col(bfus1)
    g2 = jnp.einsum('rc,ncp->nrp', wfus2, h1) + col(bfus2)
    g = g2[:, :C] * g2[:, C:]
    out = jnp.einsum('rc,ncp->nrp', wfus3, g) + col(bfus3)
    return (x + out).reshape(N, C, H, W)


if __name__ == "__main__":
    key = jax.random.PRNGKey(0)
    k_x, k_att, k_p = jax.random.split(key, 3)

    N, C, H, W = 2, 8, 16, 16          # C % 8 == 0, H == W, H*W % 128 == 0
    x = jax.random.normal(k_x, (N, C, H, W), dtype=jnp.float32)
    degrad_att = jax.random.normal(k_att, (N, 3 * C, 1, 1), dtype=jnp.float32)

    params = make_params(k_p, C, H, W)   # small C -> f32 MXU path, no casts

    y = jax.block_until_ready(mrblock_forward(x, degrad_att, params))
    assert y.shape == (N, C, H, W), y.shape
    assert bool(jnp.all(jnp.isfinite(y)))

    # correctness vs f32 reference (both use TPU default dot precision)
    y_ref = jax.block_until_ready(mrblock_reference(x, degrad_att, params))
    np.testing.assert_allclose(np.asarray(y), np.asarray(y_ref),
                               rtol=2e-2, atol=2e-2)
    print("KERNEL_OK")
</pallas_src>

<mosaic_0001>
module attributes {stable_mosaic.version = 11 : i64} {
  func.func @_mrblock_kernel(%arg0: i32, %arg1: memref<1x8x256xf32, #tpu.memory_space<vmem>>, %arg2: memref<1x1x24xf32, #tpu.memory_space<vmem>>, %arg3: memref<9x1x256xf32, #tpu.memory_space<vmem>>, %arg4: memref<136x8xf32, #tpu.memory_space<vmem>>, %arg5: memref<8x24xf32, #tpu.memory_space<vmem>>, %arg6: memref<9x32x1xf32, #tpu.memory_space<vmem>>, %arg7: memref<192x1xf32, #tpu.memory_space<vmem>>, %arg8: memref<1x8x256xf32, #tpu.memory_space<vmem>>) attributes {dimension_semantics = [#tpu.dimension_semantics<parallel>], iteration_bounds = array<i64: 2>, scalar_prefetch = 0 : i64, scratch_operands = 0 : i64, tpu.core_type = #tpu.core_type<tc>, window_params = [{transform_indices = @transform_0, window_bounds = array<i64: 1, 8, 256>}, {transform_indices = @transform_1, window_bounds = array<i64: 1, 1, 24>}, {pipeline_mode = #tpu.pipeline_mode<synchronous>, transform_indices = @transform_2, window_bounds = array<i64: 9, 1, 256>}, {pipeline_mode = #tpu.pipeline_mode<synchronous>, transform_indices = @transform_3, window_bounds = array<i64: 136, 8>}, {pipeline_mode = #tpu.pipeline_mode<synchronous>, transform_indices = @transform_4, window_bounds = array<i64: 8, 24>}, {pipeline_mode = #tpu.pipeline_mode<synchronous>, transform_indices = @transform_5, window_bounds = array<i64: 9, 32, 1>}, {pipeline_mode = #tpu.pipeline_mode<synchronous>, transform_indices = @transform_6, window_bounds = array<i64: 192, 1>}, {transform_indices = @transform_7, window_bounds = array<i64: 1, 8, 256>}]} {
    %c0 = arith.constant 0 : index
    %c0_0 = arith.constant 0 : index
    %c0_1 = arith.constant 0 : index
    %0 = vector.load %arg1[%c0, %c0_0, %c0_1] : memref<1x8x256xf32, #tpu.memory_space<vmem>>, vector<1x8x256xf32>
    %1 = vector.shape_cast %0 : vector<1x8x256xf32> to vector<8x256xf32>
    %c0_2 = arith.constant 0 : index
    %c0_3 = arith.constant 0 : index
    %2 = vector.load %arg7[%c0_2, %c0_3] : memref<192x1xf32, #tpu.memory_space<vmem>>, vector<192x1xf32>
    %3 = vector.extract_strided_slice %2 {offsets = [0, 0], sizes = [8, 1], strides = [1, 1]} : vector<192x1xf32> to vector<8x1xf32>
    %4 = vector.extract_strided_slice %2 {offsets = [8, 0], sizes = [8, 1], strides = [1, 1]} : vector<192x1xf32> to vector<8x1xf32>
    %5 = vector.extract_strided_slice %2 {offsets = [16, 0], sizes = [32, 1], strides = [1, 1]} : vector<192x1xf32> to vector<32x1xf32>
    %6 = vector.extract_strided_slice %2 {offsets = [48, 0], sizes = [32, 1], strides = [1, 1]} : vector<192x1xf32> to vector<32x1xf32>
    %7 = vector.extract_strided_slice %2 {offsets = [152, 0], sizes = [8, 1], strides = [1, 1]} : vector<192x1xf32> to vector<8x1xf32>
    %8 = vector.extract_strided_slice %2 {offsets = [160, 0], sizes = [8, 1], strides = [1, 1]} : vector<192x1xf32> to vector<8x1xf32>
    %9 = vector.extract_strided_slice %2 {offsets = [168, 0], sizes = [16, 1], strides = [1, 1]} : vector<192x1xf32> to vector<16x1xf32>
    %10 = vector.extract_strided_slice %2 {offsets = [184, 0], sizes = [8, 1], strides = [1, 1]} : vector<192x1xf32> to vector<8x1xf32>
    %cst = arith.constant dense<0.000000e+00> : vector<256xf32>
    %11 = vector.multi_reduction <add>, %1, %cst [0] : vector<8x256xf32> to vector<256xf32>
    %12 = vector.shape_cast %11 : vector<256xf32> to vector<1x256xf32>
    %cst_4 = arith.constant 8.000000e+00 : f32
    %13 = vector.broadcast %cst_4 : f32 to vector<1x256xf32>
    %14 = arith.divf %12, %13 : vector<1x256xf32>
    %15 = vector.broadcast %14 : vector<1x256xf32> to vector<8x256xf32>
    %16 = arith.subf %1, %15 : vector<8x256xf32>
    %17 = arith.mulf %16, %16 : vector<8x256xf32>
    %cst_5 = arith.constant dense<0.000000e+00> : vector<256xf32>
    %18 = vector.multi_reduction <add>, %17, %cst_5 [0] : vector<8x256xf32> to vector<256xf32>
    %19 = vector.shape_cast %18 : vector<256xf32> to vector<1x256xf32>
    %cst_6 = arith.constant 8.000000e+00 : f32
    %20 = vector.broadcast %cst_6 : f32 to vector<1x256xf32>
    %21 = arith.divf %19, %20 : vector<1x256xf32>
    %cst_7 = arith.constant 9.99999997E-7 : f32
    %22 = vector.broadcast %cst_7 : f32 to vector<1x256xf32>
    %23 = arith.addf %21, %22 : vector<1x256xf32>
    %24 = math.rsqrt %23 : vector<1x256xf32>
    %25 = vector.broadcast %24 : vector<1x256xf32> to vector<8x256xf32>
    %26 = arith.mulf %16, %25 : vector<8x256xf32>
    %27 = vector.broadcast %3 : vector<8x1xf32> to vector<8x256xf32>
    %28 = arith.mulf %27, %26 : vector<8x256xf32>
    %29 = vector.broadcast %4 : vector<8x1xf32> to vector<8x256xf32>
    %30 = arith.addf %28, %29 : vector<8x256xf32>
    %c0_8 = arith.constant 0 : index
    %c0_9 = arith.constant 0 : index
    %31 = vector.load %arg4[%c0_8, %c0_9] : memref<136x8xf32, #tpu.memory_space<vmem>>, vector<32x8xf32>
    %cst_10 = arith.constant dense<0.000000e+00> : vector<32x256xf32>
    %32 = tpu.matmul %31, %30, %cst_10 {dimension_numbers = #tpu.dot_dimension_numbers<[1], [0], [0], [1], [0, 0, 1, 1], [], []>} : vector<32x8xf32>, vector<8x256xf32>, vector<32x256xf32> -> vector<32x256xf32>
    %33 = vector.broadcast %5 : vector<32x1xf32> to vector<32x256xf32>
    %34 = arith.addf %32, %33 : vector<32x256xf32>
    %c17_i32 = arith.constant 17 : i32
    %35 = tpu.dynamic_rotate %34 by %c17_i32 dim 1 : vector<32x256xf32>, i32 -> vector<32x256xf32>
    %c0_11 = arith.constant 0 : index
    %c0_12 = arith.constant 0 : index
    %c0_13 = arith.constant 0 : index
    %36 = vector.load %arg3[%c0_11, %c0_12, %c0_13] : memref<9x1x256xf32, #tpu.memory_space<vmem>>, vector<1x1x256xf32>
    %37 = vector.shape_cast %36 : vector<1x1x256xf32> to vector<1x256xf32>
    %38 = vector.broadcast %37 : vector<1x256xf32> to vector<32x256xf32>
    %39 = arith.mulf %35, %38 : vector<32x256xf32>
    %c0_14 = arith.constant 0 : index
    %c0_15 = arith.constant 0 : index
    %c0_16 = arith.constant 0 : index
    %40 = vector.load %arg6[%c0_14, %c0_15, %c0_16] : memref<9x32x1xf32, #tpu.memory_space<vmem>>, vector<1x32x1xf32>
    %41 = vector.shape_cast %40 : vector<1x32x1xf32> to vector<32x1xf32>
    %42 = vector.broadcast %41 : vector<32x1xf32> to vector<32x256xf32>
    %43 = arith.mulf %39, %42 : vector<32x256xf32>
    %44 = vector.broadcast %6 : vector<32x1xf32> to vector<32x256xf32>
    %45 = arith.addf %43, %44 : vector<32x256xf32>
    %c16_i32 = arith.constant 16 : i32
    %46 = tpu.dynamic_rotate %34 by %c16_i32 dim 1 : vector<32x256xf32>, i32 -> vector<32x256xf32>
    %c1 = arith.constant 1 : index
    %c0_17 = arith.constant 0 : index
    %c0_18 = arith.constant 0 : index
    %47 = vector.load %arg3[%c1, %c0_17, %c0_18] : memref<9x1x256xf32, #tpu.memory_space<vmem>>, vector<1x1x256xf32>
    %48 = vector.shape_cast %47 : vector<1x1x256xf32> to vector<1x256xf32>
    %49 = vector.broadcast %48 : vector<1x256xf32> to vector<32x256xf32>
    %50 = arith.mulf %46, %49 : vector<32x256xf32>
    %c1_19 = arith.constant 1 : index
    %c0_20 = arith.constant 0 : index
    %c0_21 = arith.constant 0 : index
    %51 = vector.load %arg6[%c1_19, %c0_20, %c0_21] : memref<9x32x1xf32, #tpu.memory_space<vmem>>, vector<1x32x1xf32>
    %52 = vector.shape_cast %51 : vector<1x32x1xf32> to vector<32x1xf32>
    %53 = vector.broadcast %52 : vector<32x1xf32> to vector<32x256xf32>
    %54 = arith.mulf %50, %53 : vector<32x256xf32>
    %55 = arith.addf %45, %54 : vector<32x256xf32>
    %c15_i32 = arith.constant 15 : i32
    %56 = tpu.dynamic_rotate %34 by %c15_i32 dim 1 : vector<32x256xf32>, i32 -> vector<32x256xf32>
    %c2 = arith.constant 2 : index
    %c0_22 = arith.constant 0 : index
    %c0_23 = arith.constant 0 : index
    %57 = vector.load %arg3[%c2, %c0_22, %c0_23] : memref<9x1x256xf32, #tpu.memory_space<vmem>>, vector<1x1x256xf32>
    %58 = vector.shape_cast %57 : vector<1x1x256xf32> to vector<1x256xf32>
    %59 = vector.broadcast %58 : vector<1x256xf32> to vector<32x256xf32>
    %60 = arith.mulf %56, %59 : vector<32x256xf32>
    %c2_24 = arith.constant 2 : index
    %c0_25 = arith.constant 0 : index
    %c0_26 = arith.constant 0 : index
    %61 = vector.load %arg6[%c2_24, %c0_25, %c0_26] : memref<9x32x1xf32, #tpu.memory_space<vmem>>, vector<1x32x1xf32>
    %62 = vector.shape_cast %61 : vector<1x32x1xf32> to vector<32x1xf32>
    %63 = vector.broadcast %62 : vector<32x1xf32> to vector<32x256xf32>
    %64 = arith.mulf %60, %63 : vector<32x256xf32>
    %65 = arith.addf %55, %64 : vector<32x256xf32>
    %c1_i32 = arith.constant 1 : i32
    %66 = tpu.dynamic_rotate %34 by %c1_i32 dim 1 : vector<32x256xf32>, i32 -> vector<32x256xf32>
    %c3 = arith.constant 3 : index
    %c0_27 = arith.constant 0 : index
    %c0_28 = arith.constant 0 : index
    %67 = vector.load %arg3[%c3, %c0_27, %c0_28] : memref<9x1x256xf32, #tpu.memory_space<vmem>>, vector<1x1x256xf32>
    %68 = vector.shape_cast %67 : vector<1x1x256xf32> to vector<1x256xf32>
    %69 = vector.broadcast %68 : vector<1x256xf32> to vector<32x256xf32>
    %70 = arith.mulf %66, %69 : vector<32x256xf32>
    %c3_29 = arith.constant 3 : index
    %c0_30 = arith.constant 0 : index
    %c0_31 = arith.constant 0 : index
    %71 = vector.load %arg6[%c3_29, %c0_30, %c0_31] : memref<9x32x1xf32, #tpu.memory_space<vmem>>, vector<1x32x1xf32>
    %72 = vector.shape_cast %71 : vector<1x32x1xf32> to vector<32x1xf32>
    %73 = vector.broadcast %72 : vector<32x1xf32> to vector<32x256xf32>
    %74 = arith.mulf %70, %73 : vector<32x256xf32>
    %75 = arith.addf %65, %74 : vector<32x256xf32>
    %c4 = arith.constant 4 : index
    %c0_32 = arith.constant 0 : index
    %c0_33 = arith.constant 0 : index
    %76 = vector.load %arg6[%c4, %c0_32, %c0_33] : memref<9x32x1xf32, #tpu.memory_space<vmem>>, vector<1x32x1xf32>
    %77 = vector.shape_cast %76 : vector<1x32x1xf32> to vector<32x1xf32>
    %78 = vector.broadcast %77 : vector<32x1xf32> to vector<32x256xf32>
    %79 = arith.mulf %34, %78 : vector<32x256xf32>
    %80 = arith.addf %75, %79 : vector<32x256xf32>
    %c255_i32 = arith.constant 255 : i32
    %81 = tpu.dynamic_rotate %34 by %c255_i32 dim 1 : vector<32x256xf32>, i32 -> vector<32x256xf32>
    %c5 = arith.constant 5 : index
    %c0_34 = arith.constant 0 : index
    %c0_35 = arith.constant 0 : index
    %82 = vector.load %arg3[%c5, %c0_34, %c0_35] : memref<9x1x256xf32, #tpu.memory_space<vmem>>, vector<1x1x256xf32>
    %83 = vector.shape_cast %82 : vector<1x1x256xf32> to vector<1x256xf32>
    %84 = vector.broadcast %83 : vector<1x256xf32> to vector<32x256xf32>
    %85 = arith.mulf %81, %84 : vector<32x256xf32>
    %c5_36 = arith.constant 5 : index
    %c0_37 = arith.constant 0 : index
    %c0_38 = arith.constant 0 : index
    %86 = vector.load %arg6[%c5_36, %c0_37, %c0_38] : memref<9x32x1xf32, #tpu.memory_space<vmem>>, vector<1x32x1xf32>
    %87 = vector.shape_cast %86 : vector<1x32x1xf32> to vector<32x1xf32>
    %88 = vector.broadcast %87 : vector<32x1xf32> to vector<32x256xf32>
    %89 = arith.mulf %85, %88 : vector<32x256xf32>
    %90 = arith.addf %80, %89 : vector<32x256xf32>
    %c241_i32 = arith.constant 241 : i32
    %91 = tpu.dynamic_rotate %34 by %c241_i32 dim 1 : vector<32x256xf32>, i32 -> vector<32x256xf32>
    %c6 = arith.constant 6 : index
    %c0_39 = arith.constant 0 : index
    %c0_40 = arith.constant 0 : index
    %92 = vector.load %arg3[%c6, %c0_39, %c0_40] : memref<9x1x256xf32, #tpu.memory_space<vmem>>, vector<1x1x256xf32>
    %93 = vector.shape_cast %92 : vector<1x1x256xf32> to vector<1x256xf32>
    %94 = vector.broadcast %93 : vector<1x256xf32> to vector<32x256xf32>
    %95 = arith.mulf %91, %94 : vector<32x256xf32>
    %c6_41 = arith.constant 6 : index
    %c0_42 = arith.constant 0 : index
    %c0_43 = arith.constant 0 : index
    %96 = vector.load %arg6[%c6_41, %c0_42, %c0_43] : memref<9x32x1xf32, #tpu.memory_space<vmem>>, vector<1x32x1xf32>
    %97 = vector.shape_cast %96 : vector<1x32x1xf32> to vector<32x1xf32>
    %98 = vector.broadcast %97 : vector<32x1xf32> to vector<32x256xf32>
    %99 = arith.mulf %95, %98 : vector<32x256xf32>
    %100 = arith.addf %90, %99 : vector<32x256xf32>
    %c240_i32 = arith.constant 240 : i32
    %101 = tpu.dynamic_rotate %34 by %c240_i32 dim 1 : vector<32x256xf32>, i32 -> vector<32x256xf32>
    %c7 = arith.constant 7 : index
    %c0_44 = arith.constant 0 : index
    %c0_45 = arith.constant 0 : index
    %102 = vector.load %arg3[%c7, %c0_44, %c0_45] : memref<9x1x256xf32, #tpu.memory_space<vmem>>, vector<1x1x256xf32>
    %103 = vector.shape_cast %102 : vector<1x1x256xf32> to vector<1x256xf32>
    %104 = vector.broadcast %103 : vector<1x256xf32> to vector<32x256xf32>
    %105 = arith.mulf %101, %104 : vector<32x256xf32>
    %c7_46 = arith.constant 7 : index
    %c0_47 = arith.constant 0 : index
    %c0_48 = arith.constant 0 : index
    %106 = vector.load %arg6[%c7_46, %c0_47, %c0_48] : memref<9x32x1xf32, #tpu.memory_space<vmem>>, vector<1x32x1xf32>
    %107 = vector.shape_cast %106 : vector<1x32x1xf32> to vector<32x1xf32>
    %108 = vector.broadcast %107 : vector<32x1xf32> to vector<32x256xf32>
    %109 = arith.mulf %105, %108 : vector<32x256xf32>
    %110 = arith.addf %100, %109 : vector<32x256xf32>
    %c239_i32 = arith.constant 239 : i32
    %111 = tpu.dynamic_rotate %34 by %c239_i32 dim 1 : vector<32x256xf32>, i32 -> vector<32x256xf32>
    %c8 = arith.constant 8 : index
    %c0_49 = arith.constant 0 : index
    %c0_50 = arith.constant 0 : index
    %112 = vector.load %arg3[%c8, %c0_49, %c0_50] : memref<9x1x256xf32, #tpu.memory_space<vmem>>, vector<1x1x256xf32>
    %113 = vector.shape_cast %112 : vector<1x1x256xf32> to vector<1x256xf32>
    %114 = vector.broadcast %113 : vector<1x256xf32> to vector<32x256xf32>
    %115 = arith.mulf %111, %114 : vector<32x256xf32>
    %c8_51 = arith.constant 8 : index
    %c0_52 = arith.constant 0 : index
    %c0_53 = arith.constant 0 : index
    %116 = vector.load %arg6[%c8_51, %c0_52, %c0_53] : memref<9x32x1xf32, #tpu.memory_space<vmem>>, vector<1x32x1xf32>
    %117 = vector.shape_cast %116 : vector<1x32x1xf32> to vector<32x1xf32>
    %118 = vector.broadcast %117 : vector<32x1xf32> to vector<32x256xf32>
    %119 = arith.mulf %115, %118 : vector<32x256xf32>
    %120 = arith.addf %110, %119 : vector<32x256xf32>
    %121 = vector.extract_strided_slice %120 {offsets = [0, 0], sizes = [8, 256], strides = [1, 1]} : vector<32x256xf32> to vector<8x256xf32>
    %122 = vector.extract_strided_slice %120 {offsets = [8, 0], sizes = [8, 256], strides = [1, 1]} : vector<32x256xf32> to vector<8x256xf32>
    %123 = vector.extract_strided_slice %120 {offsets = [16, 0], sizes = [8, 256], strides = [1, 1]} : vector<32x256xf32> to vector<8x256xf32>
    %124 = vector.extract_strided_slice %120 {offsets = [24, 0], sizes = [8, 256], strides = [1, 1]} : vector<32x256xf32> to vector<8x256xf32>
    %c104 = arith.constant 104 : index
    %c0_54 = arith.constant 0 : index
    %125 = vector.load %arg4[%c104, %c0_54] : memref<136x8xf32, #tpu.memory_space<vmem>>, vector<8x8xf32>
    %126 = arith.mulf %122, %123 : vector<8x256xf32>
    %cst_55 = arith.constant dense<0.000000e+00> : vector<8x256xf32>
    %127 = tpu.matmul %125, %126, %cst_55 {dimension_numbers = #tpu.dot_dimension_numbers<[1], [0], [0], [1], [0, 0, 1, 1], [], []>} : vector<8x8xf32>, vector<8x256xf32>, vector<8x256xf32> -> vector<8x256xf32>
    %128 = vector.broadcast %7 : vector<8x1xf32> to vector<8x256xf32>
    %129 = arith.addf %127, %128 : vector<8x256xf32>
    %c32 = arith.constant 32 : index
    %c0_56 = arith.constant 0 : index
    %130 = vector.load %arg4[%c32, %c0_56] : memref<136x8xf32, #tpu.memory_space<vmem>>, vector<8x8xf32>
    %cst_57 = arith.constant dense<0.000000e+00> : vector<8x256xf32>
    %131 = tpu.matmul %130, %124, %cst_57 {dimension_numbers = #tpu.dot_dimension_numbers<[1], [0], [0], [1], [0, 0, 1, 1], [], []>} : vector<8x8xf32>, vector<8x256xf32>, vector<8x256xf32> -> vector<8x256xf32>
    %132 = vector.extract_strided_slice %2 {offsets = [80, 0], sizes = [8, 1], strides = [1, 1]} : vector<192x1xf32> to vector<8x1xf32>
    %133 = vector.broadcast %132 : vector<8x1xf32> to vector<8x256xf32>
    %134 = arith.addf %131, %133 : vector<8x256xf32>
    %c17_i32_58 = arith.constant 17 : i32
    %135 = tpu.dynamic_rotate %30 by %c17_i32_58 dim 1 : vector<8x256xf32>, i32 -> vector<8x256xf32>
    %c0_59 = arith.constant 0 : index
    %c0_60 = arith.constant 0 : index
    %c0_61 = arith.constant 0 : index
    %136 = vector.load %arg3[%c0_59, %c0_60, %c0_61] : memref<9x1x256xf32, #tpu.memory_space<vmem>>, vector<1x1x256xf32>
    %137 = vector.shape_cast %136 : vector<1x1x256xf32> to vector<1x256xf32>
    %138 = vector.broadcast %137 : vector<1x256xf32> to vector<8x256xf32>
    %139 = arith.mulf %135, %138 : vector<8x256xf32>
    %140 = arith.mulf %134, %139 : vector<8x256xf32>
    %c40 = arith.constant 40 : index
    %c0_62 = arith.constant 0 : index
    %141 = vector.load %arg4[%c40, %c0_62] : memref<136x8xf32, #tpu.memory_space<vmem>>, vector<8x8xf32>
    %cst_63 = arith.constant dense<0.000000e+00> : vector<8x256xf32>
    %142 = tpu.matmul %141, %124, %cst_63 {dimension_numbers = #tpu.dot_dimension_numbers<[1], [0], [0], [1], [0, 0, 1, 1], [], []>} : vector<8x8xf32>, vector<8x256xf32>, vector<8x256xf32> -> vector<8x256xf32>
    %143 = vector.extract_strided_slice %2 {offsets = [88, 0], sizes = [8, 1], strides = [1, 1]} : vector<192x1xf32> to vector<8x1xf32>
    %144 = vector.broadcast %143 : vector<8x1xf32> to vector<8x256xf32>
    %145 = arith.addf %142, %144 : vector<8x256xf32>
    %c16_i32_64 = arith.constant 16 : i32
    %146 = tpu.dynamic_rotate %30 by %c16_i32_64 dim 1 : vector<8x256xf32>, i32 -> vector<8x256xf32>
    %c1_65 = arith.constant 1 : index
    %c0_66 = arith.constant 0 : index
    %c0_67 = arith.constant 0 : index
    %147 = vector.load %arg3[%c1_65, %c0_66, %c0_67] : memref<9x1x256xf32, #tpu.memory_space<vmem>>, vector<1x1x256xf32>
    %148 = vector.shape_cast %147 : vector<1x1x256xf32> to vector<1x256xf32>
    %149 = vector.broadcast %148 : vector<1x256xf32> to vector<8x256xf32>
    %150 = arith.mulf %146, %149 : vector<8x256xf32>
    %151 = arith.mulf %145, %150 : vector<8x256xf32>
    %152 = arith.addf %140, %151 : vector<8x256xf32>
    %c48 = arith.constant 48 : index
    %c0_68 = arith.constant 0 : index
    %153 = vector.load %arg4[%c48, %c0_68] : memref<136x8xf32, #tpu.memory_space<vmem>>, vector<8x8xf32>
    %cst_69 = arith.constant dense<0.000000e+00> : vector<8x256xf32>
    %154 = tpu.matmul %153, %124, %cst_69 {dimension_numbers = #tpu.dot_dimension_numbers<[1], [0], [0], [1], [0, 0, 1, 1], [], []>} : vector<8x8xf32>, vector<8x256xf32>, vector<8x256xf32> -> vector<8x256xf32>
    %155 = vector.extract_strided_slice %2 {offsets = [96, 0], sizes = [8, 1], strides = [1, 1]} : vector<192x1xf32> to vector<8x1xf32>
    %156 = vector.broadcast %155 : vector<8x1xf32> to vector<8x256xf32>
    %157 = arith.addf %154, %156 : vector<8x256xf32>
    %c15_i32_70 = arith.constant 15 : i32
    %158 = tpu.dynamic_rotate %30 by %c15_i32_70 dim 1 : vector<8x256xf32>, i32 -> vector<8x256xf32>
    %c2_71 = arith.constant 2 : index
    %c0_72 = arith.constant 0 : index
    %c0_73 = arith.constant 0 : index
    %159 = vector.load %arg3[%c2_71, %c0_72, %c0_73] : memref<9x1x256xf32, #tpu.memory_space<vmem>>, vector<1x1x256xf32>
    %160 = vector.shape_cast %159 : vector<1x1x256xf32> to vector<1x256xf32>
    %161 = vector.broadcast %160 : vector<1x256xf32> to vector<8x256xf32>
    %162 = arith.mulf %158, %161 : vector<8x256xf32>
    %163 = arith.mulf %157, %162 : vector<8x256xf32>
    %164 = arith.addf %152, %163 : vector<8x256xf32>
    %c56 = arith.constant 56 : index
    %c0_74 = arith.constant 0 : index
    %165 = vector.load %arg4[%c56, %c0_74] : memref<136x8xf32, #tpu.memory_space<vmem>>, vector<8x8xf32>
    %cst_75 = arith.constant dense<0.000000e+00> : vector<8x256xf32>
    %166 = tpu.matmul %165, %124, %cst_75 {dimension_numbers = #tpu.dot_dimension_numbers<[1], [0], [0], [1], [0, 0, 1, 1], [], []>} : vector<8x8xf32>, vector<8x256xf32>, vector<8x256xf32> -> vector<8x256xf32>
    %167 = vector.extract_strided_slice %2 {offsets = [104, 0], sizes = [8, 1], strides = [1, 1]} : vector<192x1xf32> to vector<8x1xf32>
    %168 = vector.broadcast %167 : vector<8x1xf32> to vector<8x256xf32>
    %169 = arith.addf %166, %168 : vector<8x256xf32>
    %c1_i32_76 = arith.constant 1 : i32
    %170 = tpu.dynamic_rotate %30 by %c1_i32_76 dim 1 : vector<8x256xf32>, i32 -> vector<8x256xf32>
    %c3_77 = arith.constant 3 : index
    %c0_78 = arith.constant 0 : index
    %c0_79 = arith.constant 0 : index
    %171 = vector.load %arg3[%c3_77, %c0_78, %c0_79] : memref<9x1x256xf32, #tpu.memory_space<vmem>>, vector<1x1x256xf32>
    %172 = vector.shape_cast %171 : vector<1x1x256xf32> to vector<1x256xf32>
    %173 = vector.broadcast %172 : vector<1x256xf32> to vector<8x256xf32>
    %174 = arith.mulf %170, %173 : vector<8x256xf32>
    %175 = arith.mulf %169, %174 : vector<8x256xf32>
    %176 = arith.addf %164, %175 : vector<8x256xf32>
    %c64 = arith.constant 64 : index
    %c0_80 = arith.constant 0 : index
    %177 = vector.load %arg4[%c64, %c0_80] : memref<136x8xf32, #tpu.memory_space<vmem>>, vector<8x8xf32>
    %cst_81 = arith.constant dense<0.000000e+00> : vector<8x256xf32>
    %178 = tpu.matmul %177, %124, %cst_81 {dimension_numbers = #tpu.dot_dimension_numbers<[1], [0], [0], [1], [0, 0, 1, 1], [], []>} : vector<8x8xf32>, vector<8x256xf32>, vector<8x256xf32> -> vector<8x256xf32>
    %179 = vector.extract_strided_slice %2 {offsets = [112, 0], sizes = [8, 1], strides = [1, 1]} : vector<192x1xf32> to vector<8x1xf32>
    %180 = vector.broadcast %179 : vector<8x1xf32> to vector<8x256xf32>
    %181 = arith.addf %178, %180 : vector<8x256xf32>
    %182 = arith.mulf %181, %30 : vector<8x256xf32>
    %183 = arith.addf %176, %182 : vector<8x256xf32>
    %c72 = arith.constant 72 : index
    %c0_82 = arith.constant 0 : index
    %184 = vector.load %arg4[%c72, %c0_82] : memref<136x8xf32, #tpu.memory_space<vmem>>, vector<8x8xf32>
    %cst_83 = arith.constant dense<0.000000e+00> : vector<8x256xf32>
    %185 = tpu.matmul %184, %124, %cst_83 {dimension_numbers = #tpu.dot_dimension_numbers<[1], [0], [0], [1], [0, 0, 1, 1], [], []>} : vector<8x8xf32>, vector<8x256xf32>, vector<8x256xf32> -> vector<8x256xf32>
    %186 = vector.extract_strided_slice %2 {offsets = [120, 0], sizes = [8, 1], strides = [1, 1]} : vector<192x1xf32> to vector<8x1xf32>
    %187 = vector.broadcast %186 : vector<8x1xf32> to vector<8x256xf32>
    %188 = arith.addf %185, %187 : vector<8x256xf32>
    %c255_i32_84 = arith.constant 255 : i32
    %189 = tpu.dynamic_rotate %30 by %c255_i32_84 dim 1 : vector<8x256xf32>, i32 -> vector<8x256xf32>
    %c5_85 = arith.constant 5 : index
    %c0_86 = arith.constant 0 : index
    %c0_87 = arith.constant 0 : index
    %190 = vector.load %arg3[%c5_85, %c0_86, %c0_87] : memref<9x1x256xf32, #tpu.memory_space<vmem>>, vector<1x1x256xf32>
    %191 = vector.shape_cast %190 : vector<1x1x256xf32> to vector<1x256xf32>
    %192 = vector.broadcast %191 : vector<1x256xf32> to vector<8x256xf32>
    %193 = arith.mulf %189, %192 : vector<8x256xf32>
    %194 = arith.mulf %188, %193 : vector<8x256xf32>
    %195 = arith.addf %183, %194 : vector<8x256xf32>
    %c80 = arith.constant 80 : index
    %c0_88 = arith.constant 0 : index
    %196 = vector.load %arg4[%c80, %c0_88] : memref<136x8xf32, #tpu.memory_space<vmem>>, vector<8x8xf32>
    %cst_89 = arith.constant dense<0.000000e+00> : vector<8x256xf32>
    %197 = tpu.matmul %196, %124, %cst_89 {dimension_numbers = #tpu.dot_dimension_numbers<[1], [0], [0], [1], [0, 0, 1, 1], [], []>} : vector<8x8xf32>, vector<8x256xf32>, vector<8x256xf32> -> vector<8x256xf32>
    %198 = vector.extract_strided_slice %2 {offsets = [128, 0], sizes = [8, 1], strides = [1, 1]} : vector<192x1xf32> to vector<8x1xf32>
    %199 = vector.broadcast %198 : vector<8x1xf32> to vector<8x256xf32>
    %200 = arith.addf %197, %199 : vector<8x256xf32>
    %c241_i32_90 = arith.constant 241 : i32
    %201 = tpu.dynamic_rotate %30 by %c241_i32_90 dim 1 : vector<8x256xf32>, i32 -> vector<8x256xf32>
    %c6_91 = arith.constant 6 : index
    %c0_92 = arith.constant 0 : index
    %c0_93 = arith.constant 0 : index
    %202 = vector.load %arg3[%c6_91, %c0_92, %c0_93] : memref<9x1x256xf32, #tpu.memory_space<vmem>>, vector<1x1x256xf32>
    %203 = vector.shape_cast %202 : vector<1x1x256xf32> to vector<1x256xf32>
    %204 = vector.broadcast %203 : vector<1x256xf32> to vector<8x256xf32>
    %205 = arith.mulf %201, %204 : vector<8x256xf32>
    %206 = arith.mulf %200, %205 : vector<8x256xf32>
    %207 = arith.addf %195, %206 : vector<8x256xf32>
    %c88 = arith.constant 88 : index
    %c0_94 = arith.constant 0 : index
    %208 = vector.load %arg4[%c88, %c0_94] : memref<136x8xf32, #tpu.memory_space<vmem>>, vector<8x8xf32>
    %cst_95 = arith.constant dense<0.000000e+00> : vector<8x256xf32>
    %209 = tpu.matmul %208, %124, %cst_95 {dimension_numbers = #tpu.dot_dimension_numbers<[1], [0], [0], [1], [0, 0, 1, 1], [], []>} : vector<8x8xf32>, vector<8x256xf32>, vector<8x256xf32> -> vector<8x256xf32>
    %210 = vector.extract_strided_slice %2 {offsets = [136, 0], sizes = [8, 1], strides = [1, 1]} : vector<192x1xf32> to vector<8x1xf32>
    %211 = vector.broadcast %210 : vector<8x1xf32> to vector<8x256xf32>
    %212 = arith.addf %209, %211 : vector<8x256xf32>
    %c240_i32_96 = arith.constant 240 : i32
    %213 = tpu.dynamic_rotate %30 by %c240_i32_96 dim 1 : vector<8x256xf32>, i32 -> vector<8x256xf32>
    %c7_97 = arith.constant 7 : index
    %c0_98 = arith.constant 0 : index
    %c0_99 = arith.constant 0 : index
    %214 = vector.load %arg3[%c7_97, %c0_98, %c0_99] : memref<9x1x256xf32, #tpu.memory_space<vmem>>, vector<1x1x256xf32>
    %215 = vector.shape_cast %214 : vector<1x1x256xf32> to vector<1x256xf32>
    %216 = vector.broadcast %215 : vector<1x256xf32> to vector<8x256xf32>
    %217 = arith.mulf %213, %216 : vector<8x256xf32>
    %218 = arith.mulf %212, %217 : vector<8x256xf32>
    %219 = arith.addf %207, %218 : vector<8x256xf32>
    %c96 = arith.constant 96 : index
    %c0_100 = arith.constant 0 : index
    %220 = vector.load %arg4[%c96, %c0_100] : memref<136x8xf32, #tpu.memory_space<vmem>>, vector<8x8xf32>
    %cst_101 = arith.constant dense<0.000000e+00> : vector<8x256xf32>
    %221 = tpu.matmul %220, %124, %cst_101 {dimension_numbers = #tpu.dot_dimension_numbers<[1], [0], [0], [1], [0, 0, 1, 1], [], []>} : vector<8x8xf32>, vector<8x256xf32>, vector<8x256xf32> -> vector<8x256xf32>
    %222 = vector.extract_strided_slice %2 {offsets = [144, 0], sizes = [8, 1], strides = [1, 1]} : vector<192x1xf32> to vector<8x1xf32>
    %223 = vector.broadcast %222 : vector<8x1xf32> to vector<8x256xf32>
    %224 = arith.addf %221, %223 : vector<8x256xf32>
    %c239_i32_102 = arith.constant 239 : i32
    %225 = tpu.dynamic_rotate %30 by %c239_i32_102 dim 1 : vector<8x256xf32>, i32 -> vector<8x256xf32>
    %c8_103 = arith.constant 8 : index
    %c0_104 = arith.constant 0 : index
    %c0_105 = arith.constant 0 : index
    %226 = vector.load %arg3[%c8_103, %c0_104, %c0_105] : memref<9x1x256xf32, #tpu.memory_space<vmem>>, vector<1x1x256xf32>
    %227 = vector.shape_cast %226 : vector<1x1x256xf32> to vector<1x256xf32>
    %228 = vector.broadcast %227 : vector<1x256xf32> to vector<8x256xf32>
    %229 = arith.mulf %225, %228 : vector<8x256xf32>
    %230 = arith.mulf %224, %229 : vector<8x256xf32>
    %231 = arith.addf %219, %230 : vector<8x256xf32>
    %232 = tpu.concatenate %121, %129, %231 in 0 : vector<8x256xf32>, vector<8x256xf32>, vector<8x256xf32> -> vector<24x256xf32>
    %c0_106 = arith.constant 0 : index
    %c0_107 = arith.constant 0 : index
    %c0_108 = arith.constant 0 : index
    %233 = vector.load %arg2[%c0_106, %c0_107, %c0_108] : memref<1x1x24xf32, #tpu.memory_space<vmem>>, vector<1x1x24xf32>
    %234 = vector.shape_cast %233 : vector<1x1x24xf32> to vector<1x24xf32>
    %c0_109 = arith.constant 0 : index
    %c0_110 = arith.constant 0 : index
    %235 = vector.load %arg5[%c0_109, %c0_110] : memref<8x24xf32, #tpu.memory_space<vmem>>, vector<8x24xf32>
    %236 = vector.broadcast %234 : vector<1x24xf32> to vector<8x24xf32>
    %237 = arith.mulf %235, %236 : vector<8x24xf32>
    %cst_111 = arith.constant dense<0.000000e+00> : vector<8x256xf32>
    %238 = tpu.matmul %237, %232, %cst_111 {dimension_numbers = #tpu.dot_dimension_numbers<[1], [0], [0], [1], [0, 0, 1, 1], [], []>} : vector<8x24xf32>, vector<24x256xf32>, vector<8x256xf32> -> vector<8x256xf32>
    %239 = vector.broadcast %8 : vector<8x1xf32> to vector<8x256xf32>
    %240 = arith.addf %238, %239 : vector<8x256xf32>
    %c112 = arith.constant 112 : index
    %c0_112 = arith.constant 0 : index
    %241 = vector.load %arg4[%c112, %c0_112] : memref<136x8xf32, #tpu.memory_space<vmem>>, vector<16x8xf32>
    %cst_113 = arith.constant dense<0.000000e+00> : vector<16x256xf32>
    %242 = tpu.matmul %241, %240, %cst_113 {dimension_numbers = #tpu.dot_dimension_numbers<[1], [0], [0], [1], [0, 0, 1, 1], [], []>} : vector<16x8xf32>, vector<8x256xf32>, vector<16x256xf32> -> vector<16x256xf32>
    %243 = vector.broadcast %9 : vector<16x1xf32> to vector<16x256xf32>
    %244 = arith.addf %242, %243 : vector<16x256xf32>
    %245 = vector.extract_strided_slice %244 {offsets = [0, 0], sizes = [8, 256], strides = [1, 1]} : vector<16x256xf32> to vector<8x256xf32>
    %246 = vector.extract_strided_slice %244 {offsets = [8, 0], sizes = [8, 256], strides = [1, 1]} : vector<16x256xf32> to vector<8x256xf32>
    %247 = arith.mulf %245, %246 : vector<8x256xf32>
    %c128 = arith.constant 128 : index
    %c0_114 = arith.constant 0 : index
    %248 = vector.load %arg4[%c128, %c0_114] : memref<136x8xf32, #tpu.memory_space<vmem>>, vector<8x8xf32>
    %cst_115 = arith.constant dense<0.000000e+00> : vector<8x256xf32>
    %249 = tpu.matmul %248, %247, %cst_115 {dimension_numbers = #tpu.dot_dimension_numbers<[1], [0], [0], [1], [0, 0, 1, 1], [], []>} : vector<8x8xf32>, vector<8x256xf32>, vector<8x256xf32> -> vector<8x256xf32>
    %250 = vector.broadcast %10 : vector<8x1xf32> to vector<8x256xf32>
    %251 = arith.addf %249, %250 : vector<8x256xf32>
    %252 = arith.addf %1, %251 : vector<8x256xf32>
    %c0_116 = arith.constant 0 : index
    %c0_117 = arith.constant 0 : index
    %c0_118 = arith.constant 0 : index
    %253 = vector.load %arg8[%c0_116, %c0_117, %c0_118] : memref<1x8x256xf32, #tpu.memory_space<vmem>>, vector<1x8x256xf32>
    %254 = vector.shape_cast %253 : vector<1x8x256xf32> to vector<8x256xf32>
    %255 = vector.shape_cast %252 : vector<8x256xf32> to vector<1x8x256xf32>
    tpu.vector_store %arg8[%c0_116, %c0_117, %c0_118], %255 {strides = array<i32>} : memref<1x8x256xf32, #tpu.memory_space<vmem>>, vector<1x8x256xf32>,
    return
  }
  func.func @transform_0(%arg0: i32) -> (i32, i32, i32) {
    %c0_i32 = arith.constant 0 : i32
    %c0_i32_0 = arith.constant 0 : i32
    %c0_i32_1 = arith.constant 0 : i32
    return %arg0, %c0_i32, %c0_i32_0 : i32, i32, i32
  }
  func.func @transform_1(%arg0: i32) -> (i32, i32, i32) {
    %c0_i32 = arith.constant 0 : i32
    %c0_i32_0 = arith.constant 0 : i32
    %c0_i32_1 = arith.constant 0 : i32
    return %arg0, %c0_i32, %c0_i32_0 : i32, i32, i32
  }
  func.func @transform_2(%arg0: i32) -> (i32, i32, i32) {
    %c0_i32 = arith.constant 0 : i32
    %c0_i32_0 = arith.constant 0 : i32
    %c0_i32_1 = arith.constant 0 : i32
    %c0_i32_2 = arith.constant 0 : i32
    return %c0_i32, %c0_i32_0, %c0_i32_1 : i32, i32, i32
  }
  func.func @transform_3(%arg0: i32) -> (i32, i32) {
    %c0_i32 = arith.constant 0 : i32
    %c0_i32_0 = arith.constant 0 : i32
    %c0_i32_1 = arith.constant 0 : i32
    return %c0_i32, %c0_i32_0 : i32, i32
  }
  func.func @transform_4(%arg0: i32) -> (i32, i32) {
    %c0_i32 = arith.constant 0 : i32
    %c0_i32_0 = arith.constant 0 : i32
    %c0_i32_1 = arith.constant 0 : i32
    return %c0_i32, %c0_i32_0 : i32, i32
  }
  func.func @transform_5(%arg0: i32) -> (i32, i32, i32) {
    %c0_i32 = arith.constant 0 : i32
    %c0_i32_0 = arith.constant 0 : i32
    %c0_i32_1 = arith.constant 0 : i32
    %c0_i32_2 = arith.constant 0 : i32
    return %c0_i32, %c0_i32_0, %c0_i32_1 : i32, i32, i32
  }
  func.func @transform_6(%arg0: i32) -> (i32, i32) {
    %c0_i32 = arith.constant 0 : i32
    %c0_i32_0 = arith.constant 0 : i32
    %c0_i32_1 = arith.constant 0 : i32
    return %c0_i32, %c0_i32_0 : i32, i32
  }
  func.func @transform_7(%arg0: i32) -> (i32, i32, i32) {
    %c0_i32 = arith.constant 0 : i32
    %c0_i32_0 = arith.constant 0 : i32
    %c0_i32_1 = arith.constant 0 : i32
    return %arg0, %c0_i32, %c0_i32_0 : i32, i32, i32
  }
}

</mosaic_0001>

<bundles_post_ra>
// kernel: tpu_custom_call.1
= control target key start
LH: loop header
LB: loop body
LE: loop exit
PB: predicated region body
PF: predicated region fallthrough
CT: control target
= control target key end

     0   :  { %12 = vsyncpa [#allocation3], 0  ;;  %s3962_s0 = inlined_call_operand.vmem [shape: f32[2,8,256], index: 0, kind: input, shape index: {}]   ;;  %s3963_s1 = inlined_call_operand.vmem [shape: f32[2,1,24], index: 1, kind: input, shape index: {}]   ;;  %s3964_s2 = inlined_call_operand.vmem [shape: f32[9,1,256], index: 2, kind: input, shape index: {}]   ;;  %s3965_s3 = inlined_call_operand.vmem [shape: f32[136,8], index: 3, kind: input, shape index: {}]   ;;  %s3966_s4 = inlined_call_operand.vmem [shape: f32[8,24], index: 4, kind: input, shape index: {}]   ;;  %s3967_s5 = inlined_call_operand.vmem [shape: f32[9,32,1], index: 5, kind: input, shape index: {}]   ;;  %s3968_s6 = inlined_call_operand.vmem [shape: f32[192,1], index: 6, kind: input, shape index: {}]   ;;  %s3969_s7 = inlined_call_operand.hbm [shape: f32[2,8,256], index: 7, kind: output, shape index: {}]  }
   0x1   :  { %14 = vsyncpa [#allocation3 + $0x1], 0  ;;  %s2748_s24 = smov 0   ;;  %s2750_s25 = smov 0  }
   0x2   :  { %s2752_s26 = smov 0   ;;  %s2754_s27 = smov 0  }
   0x3 LB: > { %s2769_s28 = sadd.s32 4294967295, %s2695_s27   ;;  %s2506_s29 = sadd.s32 4294967294, %s2695_s27   ;;  %s2695_s27 = sphi %s2754_s27, %s4066_s27   ;;  %s2691_s26 = sphi %s2752_s26, %s4065_s26   ;;  %s2687_s25 = sphi %s2750_s25, %s4064_s25   ;;  %s2683_s24 = sphi %s2748_s24, %s4063_s24  }
   0x4   : > { %s2773_s30 = sadd.s32 1, %s2695_s27   ;;  %s184_s8 = sadd.s32 1, %s2691_s26 }
   0x5   : > { %s181_s9 = ssub.s32 %s2695_s27, %s2773_s30  ;;  %p194_p0 = scmp.ne.s32.totalorder %s2691_s26, %s2687_s25 }
   0x6   : > { %p182_p1 = scmp.eq.s32.totalorder %s181_s9, 0  ;;  %p195_p2 = scmp.eq.s32.totalorder %s2769_s28, 1 }
   0x7   : > { %p200_p3 = scmp.ne.s32.totalorder %s2687_s25, %s2683_s24  ;;  %p201_p4 = scmp.eq.s32.totalorder %s2506_s29, 1 }
   0x8   : > { %s2784_s10 = scalar_select %p182_p1, %s2691_s26, %s184_s8  }
   0x9   : > { %p2786_p5 = por %p195_p2, %p194_p0  ;;  %p2790_p6 = por %p201_p4, %p200_p3 }
   0xa   : > { %p2509_p7 = scmp.ge.s32.totalorder %s2695_s27, 1  ;;  %p248_p8 = scmp.lt.s32.totalorder %s2695_s27, 3 }
   0xc   : > { %p249_p9 = pnand %p2509_p7, %p248_p8 }
   0xe   : > { %252 = sbr.rel (%p249_p9) target bundleno = 1426 (0x592), region = 48 }
  0x13   : > { %v293_v0 = vld [vmem:[%s3968_s6] sm:$0xff]  ;;  %v2697_v1 = vmov 0   ;;  %v294_v2 = vld [vmem:[%s3968_s6 + $0x8] sm:$0xff]  ;;  %v3978_v3 = vmov 0.0   ;;  %v545_v5 = vld [vmem:[%s3967_s5 + $0x10] sm:$0xff]  ;;  %p283_p10 = scmp.lt.s32.totalorder %s2769_s28, 1 }
  0x14   : > { %2627 = vset.pattern.permute.xlu0 %v2697_v1  ;;  %2628 = vset.pattern.permute.xlu1 %v2697_v1  ;;  %v298_v4 = vld [vmem:[%s3968_s6 + $0x28] sm:$0xff]  ;;  %v296_v6 = vld [vmem:[%s3968_s6 + $0x18] sm:$0xff]  ;;  %v301_v7 = vld [vmem:[%s3968_s6 + $0x40] sm:$0xff]  ;;  %vm394_vm0 = vcmask 64512   ;;  %s2699_s18 = smov 15   ;;  %s2700_s19 = smov 17  }
  0x15   : > { %358 = vperm.xlu0 %2627, %v293_v0   ;;  %471 = vmatprep.mubr.f32.mxu0 %v3978_v3  ;;  %v297_v8 = vld [vmem:[%s3968_s6 + $0x20] sm:$0xff]  ;;  %v2520_v9 = vld [vmem:[%s3967_s5 + $0x30] sm:$0xff]  ;;  %v544_v10 = vld [vmem:[%s3967_s5 + $0x8] sm:$0xff]  ;;  %s2833_s21 = scalar_select %p283_p10, %s2769_s28, 1  ;;  %vm2167_vm9 = vcmask 195584  }
  0x16   : > { %1328 = vmatprep.mubr.f32.mxu1 %v3978_v3  ;;  %381 = vperm.xlu1 %2628, %v296_v6   ;;  %v2525_v11 = vld [vmem:[%s3967_s5 + $0x50] sm:$0xff]  ;;  %v300_v12 = vld [vmem:[%s3968_s6 + $0x38] sm:$0xff]  ;;  %v2529_v13 = vld [vmem:[%s3967_s5 + $0x68] sm:$0xff]  ;;  %s2701_s20 = smov 1   ;;  %s2702_s22 = smov 16  }
  0x17   : > { %v2519_v14 = vld [vmem:[%s3967_s5 + $0x28] sm:$0xff]  ;;  %s2576_s9 = sshll.u32 %s2833_s21, 4  ;;  %v546_v20 = vld [vmem:[%s3967_s5 + $0x18] sm:$0xff]  ;;  %v2530_v24 = vld [vmem:[%s3967_s5 + $0x70] sm:$0xff]  ;;  %s3972_s23 = smov 127  }
  0x18   : > { %v302_v15 = vld [vmem:[%s3968_s6 + $0x48] sm:$0xff]  ;;  %s2848_s17 = scalar_lea.vmem %s3962_s0, %s2576_s9  ;;  %v2526_v21 = vld [vmem:[%s3967_s5 + $0x58] sm:$0xff]  ;;  %v2539_v25 = vld [vmem:[%s3967_s5 + $0xb0] sm:$0xff]  ;;  %s3976_s29 = smov 113  }
  0x19   : > { %365 = vperm.xlu0 %2627, %v294_v2   ;;  %v2524_v16 = vld [vmem:[%s3967_s5 + $0x48] sm:$0xff]  ;;  %v291_v18 = vld [vmem:[%s2848_s17] sm:$0xff]  ;;  %v2521_v28 = vld [vmem:[%s3967_s5 + $0x38] sm:$0xff]  ;;  %s3970_s8 = smov 112   ;;  %s3974_s9 = smov 111  }
  0x1a   : > { %386 = vperm.xlu1 %2628, %v297_v8   ;;  %v2533_v17 = vld [vmem:[%s3967_s5 + $0x88] sm:$0xff]  ;;  %v317_v22 = vrot.slane %v291_v18, 4  ;;  %v2534_v32 = vld [vmem:[%s3967_s5 + $0x90] sm:$0xff]  ;;  %v2535_v33 = vld [vmem:[%s3967_s5 + $0x98] sm:$0xff]  ;;  %s4044_s13 = smov 113  }
  0x1b   : > { %v292_v19 = vld [vmem:[%s2848_s17 + $0x8] sm:$0xff]  ;;  %v2549_v37 = vld [vmem:[%s3967_s5 + $0xf0] sm:$0xff]  ;;  %v2531_v40 = vld [vmem:[%s3967_s5 + $0x78] sm:$0xff] }
  0x1c   : > { %v323_v23 = vrot.slane %v292_v19, 4  ;;  %v318_v26 = vadd.f32 %v317_v22, %v291_v18  ;;  %v2543_v29 = vld [vmem:[%s3967_s5 + $0xc8] sm:$0xff]  ;;  %v2544_v44 = vld [vmem:[%s3967_s5 + $0xd0] sm:$0xff]  ;;  %v2545_v45 = vld [vmem:[%s3967_s5 + $0xd8] sm:$0xff] }
  0x1d   : > { %391 = vperm.xlu0 %2627, %v298_v4   ;;  %v2538_v36 = vld [vmem:[%s3967_s5 + $0xa8] sm:$0xff]  ;;  %v2540_v51 = vld [vmem:[%s3967_s5 + $0xb8] sm:$0xff]  ;;  %v2554_v54 = vld [vmem:[%s3967_s5 + $0x110] sm:$0xff] }
  0x1e   : > { %554 = vperm.xlu1 %2628, %v544_v10   ;;  %v324_v27 = vadd.f32 %v323_v23, %v292_v19  ;;  %v319_v30 = vrot.slane %v318_v26, 2  ;;  %v2553_v41 = vld [vmem:[%s3967_s5 + $0x108] sm:$0xff]  ;;  %v2550_v57 = vld [vmem:[%s3967_s5 + $0xf8] sm:$0xff] }
  0x1f   : > { %v2548_v48 = vld [vmem:[%s3967_s5 + $0xe8] sm:$0xff]  ;;  %v373_v22 = vld [vmem:[%s3965_s3 + $0x18] sm:$0xff] }
  0x20   : > { %v325_v31 = vrot.slane %v324_v27, 2  ;;  %v320_v34 = vadd.f32 %v319_v30, %v318_v26 }
  0x21   : > { %559 = vperm.xlu0 %2627, %v545_v5  }
  0x22   : > { %582 = vperm.xlu1 %2628, %v300_v12   ;;  %v326_v35 = vadd.f32 %v325_v31, %v324_v27  ;;  %v321_v38 = vrot.slane %v320_v34, 1 }
  0x24   : > { %v327_v39 = vrot.slane %v326_v35, 1  ;;  %v322_v42 = vadd.f32 %v321_v38, %v320_v34 }
  0x25   : > { %587 = vperm.xlu0 %2627, %v301_v7  }
  0x26   : > { %661 = vperm.xlu1 %2628, %v2519_v14   ;;  %v328_v43 = vadd.f32 %v327_v39, %v326_v35  ;;  %v330_v46 = vmul.f32 0.125, %v322_v42 }
  0x28   : > { %v331_v47 = vmul.f32 0.125, %v328_v43  ;;  %v332_v49 = vsub.f32 %v291_v18, %v330_v46 }
  0x29   : > { %666 = vperm.xlu0 %2627, %v2520_v9  }
  0x2a   : > { %748 = vperm.xlu1 %2628, %v2524_v16   ;;  %v333_v50 = vsub.f32 %v292_v19, %v331_v47  ;;  %v334_v52 = vmul.f32 %v332_v49, %v332_v49  ;;  %v370_v19 = vld [vmem:[%s3965_s3] sm:$0xff] }
  0x2c   : > { %v335_v53 = vmul.f32 %v333_v50, %v333_v50  ;;  %v336_v55 = vrot.slane %v334_v52, 4 }
  0x2d   : > { %753 = vperm.xlu0 %2627, %v2525_v11  }
  0x2e   : > { %564 = vperm.xlu1 %2628, %v546_v20   ;;  %v342_v56 = vrot.slane %v335_v53, 4  ;;  %v337_v58 = vadd.f32 %v336_v55, %v334_v52  ;;  %v371_v20 = vld [vmem:[%s3965_s3 + $0x8] sm:$0xff] }
  0x30   : > { %v343_v59 = vadd.f32 %v342_v56, %v335_v53  ;;  %v338_v60 = vrot.slane %v337_v58, 2 }
  0x31   : > { %835 = vperm.xlu0 %2627, %v2529_v13  }
  0x32   : > { %840 = vperm.xlu1 %2628, %v2530_v24   ;;  %v344_v61 = vrot.slane %v343_v59, 2  ;;  %v339_v62 = vadd.f32 %v338_v60, %v337_v58 }
  0x34   : > { %v345_v63 = vadd.f32 %v344_v61, %v343_v59  ;;  %v340_v0 = vrot.slane %v339_v62, 1  ;;  %v2555_v59 = vld [vmem:[%s3967_s5 + $0x118] sm:$0xff] }
  0x35   : > { %592 = vperm.xlu0 %2627, %v302_v15  }
  0x36   : > { %671 = vperm.xlu1 %2628, %v2521_v28   ;;  %v346_v1 = vrot.slane %v345_v63, 1  ;;  %v341_v2 = vadd.f32 %v340_v0, %v339_v62  ;;  %v295_v0 = vld [vmem:[%s3968_s6 + $0x10] sm:$0xff] }
  0x38   : > { %v347_v4 = vadd.f32 %v346_v1, %v345_v63  ;;  %v348_v5 = vmul.f32 0.125, %v341_v2  ;;  %v303_v1 = vld [vmem:[%s3968_s6 + $0x50] sm:$0xff]  ;;  %v304_v2 = vld [vmem:[%s3968_s6 + $0x58] sm:$0xff] }
  0x39   : > { %876 = vperm.xlu0 %2627, %v2533_v17  }
  0x3a   : > { %881 = vperm.xlu1 %2628, %v2534_v32   ;;  %v349_v6 = vmul.f32 0.125, %v347_v4  ;;  %v350_v7 = vadd.f32 1e-06, %v348_v5 }
  0x3c   : > { %v351_v8 = vadd.f32 1e-06, %v349_v6  ;;  %2629 = vrsqrt.f32 %v350_v7  ;;  %v305_v6 = vld [vmem:[%s3968_s6 + $0x60] sm:$0xff] }
  0x3d   : > { %758 = vperm.xlu0 %2627, %v2526_v21   ;;  %v372_v21 = vld [vmem:[%s3965_s3 + $0x10] sm:$0xff]  ;;  %v543_v7 = vld [vmem:[%s3967_s5] sm:$0xff] }
  0x3e   : > { %963 = vperm.xlu1 %2628, %v2538_v36   ;;  %2631 = vrsqrt.f32 %v351_v8 }
  0x41   : > { %968 = vperm.xlu0 %2627, %v2539_v25  }
  0x42   : > { %845 = vperm.xlu1 %2628, %v2531_v40  }
  0x45   : > { %1050 = vperm.xlu0 %2627, %v2543_v29  }
  0x46   : > { %1055 = vperm.xlu1 %2628, %v2544_v44  }
  0x49   : > { %886 = vperm.xlu0 %2627, %v2535_v33   ;;  %v2630_v9 = vpop.eup %2629 }
  0x4a   : > { %1137 = vperm.xlu1 %2628, %v2548_v48   ;;  %v354_v11 = vmul.f32 %v2630_v9, %v332_v49 }
  0x4b   : > { %v2632_v10 = vpop.eup %2631 }
  0x4c   : > { %v355_v12 = vmul.f32 %v2632_v10, %v333_v50 }
  0x4d   : > { %1142 = vperm.xlu0 %2627, %v2549_v37  }
  0x4e   : > { %973 = vperm.xlu1 %2628, %v2540_v51  }
  0x51   : > { %1224 = vperm.xlu0 %2627, %v2553_v41  }
  0x52   : > { %1229 = vperm.xlu1 %2628, %v2554_v54  }
  0x55   : > { %1060 = vperm.xlu0 %2627, %v2545_v45  }
  0x56   : > { %1147 = vperm.xlu1 %2628, %v2550_v57  }
  0x90   : > { %v359_v13 = vpop.permute.xlu0 %358 }
  0x91   : > { %v361_v14 = vmul.f32 %v359_v13, %v354_v11  ;;  %v362_v15 = vmul.f32 %v359_v13, %v355_v12  ;;  %v382_v25 = vpop.permute.xlu1 %381  ;;  %v306_v12 = vld [vmem:[%s3968_s6 + $0x68] sm:$0xff] }
  0x94   : > { %v366_v16 = vpop.permute.xlu0 %365 }
  0x95   : > { %v2912_v17 = vadd.f32 %v366_v16, %v361_v14  ;;  %v2914_v18 = vadd.f32 %v366_v16, %v362_v15  ;;  %v387_v30 = vpop.permute.xlu1 %386 }
  0x97   : > { %4008 = vst [vmem:[#allocation5_spill] sm:$0xff] %v2912_v17  ;;  %4009 = vst [vmem:[#allocation6_spill] sm:$0xff] %v2914_v18  ;;  %437 = vmatprep.subr.mxu0 %v2914_v18 }
  0x98   : > { %438 = vmatpush1.msra.mxu0 %v2912_v17  ;;  %v392_v31 = vpop.permute.xlu0 %391 }
  0x99   : > { %2513 = vmatmul.mubr.msk.f32.vlgmr.msra.gmra.mxu0 %vm394_vm0, %v370_v19  ;;  %v2974_v32 = vpop.permute.xlu1 %554 }
  0x9a   : > { %477 = vmatprep.mubr.f32.mxu0 %v3978_v3 }
  0x9c   : > { %v2982_v35 = vpop.permute.xlu0 %559 }
  0x9d   : > { %2514 = vmatmul.mubr.msk.f32.gmra.mxu0 %vm394_vm0, %v371_v20  ;;  %v2984_v36 = vpop.permute.xlu1 %582 }
  0x9e   : > { %483 = vmatprep.mubr.f32.mxu0 %v3978_v3 }
  0xa0   : > { %v2994_v37 = vpop.permute.xlu0 %587 }
  0xa1   : > { %2515 = vmatmul.mubr.msk.f32.gmra.mxu0 %vm394_vm0, %v372_v21  ;;  %v2996_v38 = vpop.permute.xlu1 %661 }
  0xa2   : > { %489 = vmatprep.mubr.f32.mxu0 %v3978_v3 }
  0xa4   : > { %v3002_v40 = vpop.permute.xlu0 %666 }
  0xa5   : > { %2516 = vmatmul.mubr.msk.f32.gmra.mxu0 %vm394_vm0, %v373_v22  ;;  %v3004_v41 = vpop.permute.xlu1 %748 }
  0xa6   : > { %1682 = vmatprep.mubr.f32.mxu0 %v3978_v3 }
  0xa8   : > { %v3016_v43 = vpop.permute.xlu0 %753 }
  0xa9   : > { %v3018_v44 = vpop.permute.xlu1 %564 }
  0xaa   : > { %4012 = vst [vmem:[#allocation9_spill] sm:$0xff] %v3018_v44 }
  0xac   : > { %v3024_v45 = vpop.permute.xlu0 %835 }
  0xad   : > { %v3026_v46 = vpop.permute.xlu1 %840 }
  0xb0   : > { %v3036_v48 = vpop.permute.xlu0 %592 }
  0xb1   : > { %4013 = vst [vmem:[#allocation10_spill] sm:$0xff] %v3036_v48  ;;  %v3038_v49 = vpop.permute.xlu1 %671 }
  0xb2   : > { %4014 = vst [vmem:[#allocation11_spill] sm:$0xff] %v3038_v49 }
  0xb4   : > { %v3046_v52 = vpop.permute.xlu0 %876 }
  0xb5   : > { %v3048_v53 = vpop.permute.xlu1 %881 }
  0xb8   : > { %v3060_v55 = vpop.permute.xlu0 %758 }
  0xb9   : > { %4017 = vst [vmem:[#allocation14_spill] sm:$0xff] %v3060_v55  ;;  %v3062_v56 = vpop.permute.xlu1 %963 }
  0xbc   : > { %v3068_v57 = vpop.permute.xlu0 %968 }
  0xbd   : > { %v3070_v58 = vpop.permute.xlu1 %845 }
  0xbe   : > { %4018 = vst [vmem:[#allocation15_spill] sm:$0xff] %v3070_v58 }
  0xc0   : > { %v3083_v60 = vpop.permute.xlu0 %1050 }
  0xc1   : > { %v3085_v61 = vpop.permute.xlu1 %1055 }
  0xc4   : > { %v3089_v62 = vpop.permute.xlu0 %886 }
  0xc5   : > { %4019 = vst [vmem:[#allocation16_spill] sm:$0xff] %v3089_v62  ;;  %v3091_v63 = vpop.permute.xlu1 %1137 }
  0xc8   : > { %v3108_v4 = vpop.permute.xlu0 %1142 }
  0xc9   : > { %v3110_v5 = vpop.permute.xlu1 %973 }
  0xca   : > { %4020 = vst [vmem:[#allocation17_spill] sm:$0xff] %v3110_v5 }
  0xcc   : > { %v3118_v8 = vpop.permute.xlu0 %1224 }
  0xcd   : > { %v3120_v9 = vpop.permute.xlu1 %1229 }
  0xce   : > { %4021 = vst [vmem:[#allocation18_spill] sm:$0xff] %v3120_v9 }
  0xd0   : > { %v3126_v10 = vpop.permute.xlu0 %1060 }
  0xd1   : > { %4022 = vst [vmem:[#allocation19_spill] sm:$0xff] %v3126_v10  ;;  %v3128_v11 = vpop.permute.xlu1 %1147 }
  0xd2   : > { %4023 = vst [vmem:[#allocation20_spill] sm:$0xff] %v3128_v11 }
 0x159   : > { %v2938_v23 = vpop.f32.mrf.mxu0 }
 0x15a   : > { %4010 = vst [vmem:[#allocation7_spill] sm:$0xff] %v2938_v23 }
 0x15b   : > { %v2940_v24 = vpop.f32.mrf.mxu0 }
 0x15c   : > { %4011 = vst [vmem:[#allocation8_spill] sm:$0xff] %v2940_v24 }
 0x15d   : > { %v479_v26 = vpop.f32.mrf.mxu0 }
 0x15e   : > { %v2942_v27 = vadd.f32 %v479_v26, %v382_v25 }
 0x15f   : > { %v481_v28 = vpop.f32.mrf.mxu0 }
 0x160   : > { %692 = vrot.lane.b32.xlu0 %v2942_v27, %s2699_s18  ;;  %498 = vrot.lane.b32.xlu1 %v2942_v27, %s2700_s19  ;;  %v2960_v29 = vadd.f32 %v481_v28, %v382_v25  ;;  %v512_v25 = vlaneseq }
 0x161   : > { %v485_v33 = vpop.f32.mrf.mxu0 }
 0x162   : > { %v2980_v34 = vadd.f32 %v485_v33, %v387_v30 }
 0x163   : > { %v487_v39 = vpop.f32.mrf.mxu0 }
 0x164   : > { %779 = vrot.lane.b32.xlu0 %v2942_v27, %s2701_s20  ;;  %605 = vrot.lane.b32.xlu1 %v2942_v27, %s2702_s22  ;;  %v3010_v42 = vadd.f32 %v487_v39, %v387_v30  ;;  %v526_v30 = vshrl.u32 %v512_v25, 7 }
 0x165   : > { %v491_v47 = vpop.f32.mrf.mxu0 }
 0x166   : > { %v3040_v50 = vadd.f32 %v491_v47, %v392_v31  ;;  %v3147_v47 = vsub.s32 0, %v526_v30 }
 0x167   : > { %v493_v51 = vpop.f32.mrf.mxu0 }
 0x168   : > { %907 = vrot.lane.b32.xlu0 %v2942_v27, %s3972_s23  ;;  %994 = vrot.lane.b32.xlu1 %v2942_v27, %s3976_s29  ;;  %4015 = vst [vmem:[#allocation12_spill] sm:$0xff] %v3040_v50  ;;  %v3054_v54 = vadd.f32 %v493_v51, %v392_v31  ;;  %v3145_v31 = vand.u32 127, %v512_v25  ;;  %v3149_v51 = vsub.s32 1, %v526_v30 }
 0x16a   : > { %4016 = vst [vmem:[#allocation13_spill] sm:$0xff] %v3054_v54  ;;  %vm514_vm1 = vcmp.lt.s32.totalorder %v3145_v31, 17  ;;  %vm619_vm2 = vcmp.lt.s32.totalorder %v3145_v31, 16  ;;  %vm706_vm3 = vcmp.lt.s32.totalorder %v3145_v31, 15  ;;  %vm793_vm4 = vcmp.lt.s32.totalorder %v3145_v31, 1 }
 0x16b   : > { %vm921_vm5 = vcmp.lt.s32.totalorder %v3145_v31, 127  ;;  %vm1008_vm6 = vcmp.lt.s32.totalorder %v3145_v31, 113  ;;  %vm1095_vm7 = vcmp.lt.s32.totalorder %v3145_v31, 112  ;;  %vm1182_vm8 = vcmp.lt.s32.totalorder %v3145_v31, 111 }
 0x16c   : > { %1081 = vrot.lane.b32.xlu0 %v2942_v27, %s3970_s8  ;;  %1168 = vrot.lane.b32.xlu1 %v2942_v27, %s3974_s9 }
 0x170   : > { %700 = vrot.lane.b32.xlu0 %v2960_v29, %s2699_s18  ;;  %506 = vrot.lane.b32.xlu1 %v2960_v29, %s2700_s19 }
 0x174   : > { %787 = vrot.lane.b32.xlu0 %v2960_v29, %s2701_s20  ;;  %613 = vrot.lane.b32.xlu1 %v2960_v29, %s2702_s22 }
 0x178   : > { %915 = vrot.lane.b32.xlu0 %v2960_v29, %s3972_s23  ;;  %1002 = vrot.lane.b32.xlu1 %v2960_v29, %s3976_s29 }
 0x17c   : > { %1089 = vrot.lane.b32.xlu0 %v2960_v29, %s3970_s8  ;;  %1176 = vrot.lane.b32.xlu1 %v2960_v29, %s3974_s9 }
 0x180   : > { %500 = vrot.lane.b32.xlu0 %v2980_v34, %s2700_s19  ;;  %694 = vrot.lane.b32.xlu1 %v2980_v34, %s2699_s18 }
 0x184   : > { %607 = vrot.lane.b32.xlu0 %v2980_v34, %s2702_s22  ;;  %781 = vrot.lane.b32.xlu1 %v2980_v34, %s2701_s20 }
 0x188   : > { %996 = vrot.lane.b32.xlu0 %v2980_v34, %s3976_s29  ;;  %909 = vrot.lane.b32.xlu1 %v2980_v34, %s3972_s23 }
 0x18c   : > { %1170 = vrot.lane.b32.xlu0 %v2980_v34, %s3974_s9  ;;  %1083 = vrot.lane.b32.xlu1 %v2980_v34, %s3970_s8 }
 0x190   : > { %508 = vrot.lane.b32.xlu0 %v3010_v42, %s2700_s19  ;;  %702 = vrot.lane.b32.xlu1 %v3010_v42, %s2699_s18 }
 0x194   : > { %615 = vrot.lane.b32.xlu0 %v3010_v42, %s2702_s22  ;;  %789 = vrot.lane.b32.xlu1 %v3010_v42, %s2701_s20 }
 0x198   : > { %1004 = vrot.lane.b32.xlu0 %v3010_v42, %s3976_s29  ;;  %917 = vrot.lane.b32.xlu1 %v3010_v42, %s3972_s23 }
 0x19c   : > { %1178 = vrot.lane.b32.xlu0 %v3010_v42, %s3974_s9  ;;  %1091 = vrot.lane.b32.xlu1 %v3010_v42, %s3970_s8 }
 0x1a0   : > { %502 = vrot.lane.b32.xlu0 %v3040_v50, %s2700_s19  ;;  %696 = vrot.lane.b32.xlu1 %v3040_v50, %s2699_s18 }
 0x1a4   : > { %609 = vrot.lane.b32.xlu0 %v3040_v50, %s2702_s22  ;;  %998 = vrot.lane.b32.xlu1 %v3040_v50, %s3976_s29 }
 0x1a8   : > { %783 = vrot.lane.b32.xlu0 %v3040_v50, %s2701_s20  ;;  %510 = vrot.lane.b32.xlu1 %v3054_v54, %s2700_s19 }
 0x1ac   : > { %911 = vrot.lane.b32.xlu0 %v3040_v50, %s3972_s23  ;;  %617 = vrot.lane.b32.xlu1 %v3054_v54, %s2702_s22 }
 0x1b0   : > { %1085 = vrot.lane.b32.xlu0 %v3040_v50, %s3970_s8  ;;  %791 = vrot.lane.b32.xlu1 %v3054_v54, %s2701_s20 }
 0x1b4   : > { %704 = vrot.lane.b32.xlu0 %v3054_v54, %s2699_s18  ;;  %919 = vrot.lane.b32.xlu1 %v3054_v54, %s3972_s23 }
 0x1b8   : > { %1234 = vperm.xlu0 %2627, %v2555_v59   ;;  %1093 = vrot.lane.b32.xlu1 %v3054_v54, %s3970_s8  ;;  %v523_v59 = vld [vmem:[%s3964_s2] sm:$0x3] }
 0x1bc   : > { %1006 = vrot.lane.b32.xlu0 %v3054_v54, %s3976_s29  ;;  %1172 = vrot.lane.b32.xlu1 %v3040_v50, %s3974_s9  ;;  %v2536_v50 = vld [vmem:[%s3964_s2 + $0xa] sm:$0x3]  ;;  %s4046_s29 = smov 111  }
 0x1bd   : > { %v3242_v55 = vrot.slane %v2536_v50, %v3149_v51 }
 0x1c0   : > { %1180 = vrot.lane.b32.xlu0 %v3054_v54, %s3974_s9  ;;  %376 = vperm.xlu1 %2628, %v295_v0   ;;  %v2517_v0 = vld [vmem:[%s3964_s2 + $0x2] sm:$0x3]  ;;  %v2527_v54 = vld [vmem:[%s3964_s2 + $0x6] sm:$0x3]  ;;  %s290_s9 = scalar_lea.vmem %s3963_s1, %s2833_s21 }
 0x1c1   : > { %v3170_v30 = vrot.slane %v2517_v0, %v3147_v47  ;;  %v3173_v3 = vrot.slane %v2517_v0, %v3149_v51 }
 0x1c4   : > { %1338 = vperm.xlu0 %2627, %v303_v1   ;;  %1428 = vperm.xlu1 %2628, %v304_v2  }
 0x1c8   : > { %1520 = vperm.xlu0 %2627, %v305_v6   ;;  %549 = vperm.xlu1 %2628, %v543_v7   ;;  %v3159_v6 = vrot.slane %v523_v59, %v3147_v47  ;;  %v3162_v7 = vrot.slane %v523_v59, %v3149_v51 }
 0x1cc   : > { %1415 = vrot.lane.b32.xlu0 %v2912_v17, %s2700_s19  ;;  %1417 = vrot.lane.b32.xlu1 %v2914_v18, %s2700_s19 }
 0x1d0   : > { %1505 = vrot.lane.b32.xlu0 %v2912_v17, %s2702_s22  ;;  %1507 = vrot.lane.b32.xlu1 %v2914_v18, %s2702_s22 }
 0x1d2   : > { %v693_v13 = vpop.permute.xlu0 %692  ;;  %v499_v14 = vpop.permute.xlu1 %498 }
 0x1d4   : > { %1612 = vperm.xlu0 %2627, %v306_v12  }
 0x1d6   : > { %v780_v15 = vpop.permute.xlu0 %779  ;;  %v606_v16 = vpop.permute.xlu1 %605 }
 0x1da   : > { %v3137_v19 = vpop.permute.xlu0 %907  ;;  %v3139_v20 = vpop.permute.xlu1 %994 }
 0x1de   : > { %v3141_v21 = vpop.permute.xlu0 %1081  ;;  %v3143_v22 = vpop.permute.xlu1 %1168 }
 0x1e2   : > { %v701_v26 = vpop.permute.xlu0 %700  ;;  %v507_v28 = vpop.permute.xlu1 %506 }
 0x1e3   : > { %v516_v12 = vsel %vm514_vm1, %v499_v14, %v507_v28  ;;  %v520_v25 = vsel %vm514_vm1, %v507_v28, %v499_v14  ;;  %v2522_v14 = vld [vmem:[%s3964_s2 + $0x4] sm:$0x3] }
 0x1e4   : > { %v537_v28 = vmul.f32 %v3159_v6, %v520_v25  ;;  %v538_v23 = vmul.f32 %v3162_v7, %v516_v12  ;;  %v708_v25 = vsel %vm706_vm3, %v693_v13, %v701_v26  ;;  %v712_v12 = vsel %vm706_vm3, %v701_v26, %v693_v13 }
 0x1e6   : > { %v788_v33 = vpop.permute.xlu0 %787  ;;  %v614_v39 = vpop.permute.xlu1 %613 }
 0x1e7   : > { %v621_v17 = vsel %vm619_vm2, %v606_v16, %v614_v39  ;;  %v625_v59 = vsel %vm619_vm2, %v614_v39, %v606_v16  ;;  %v3192_v16 = vrot.slane %v2522_v14, %v3147_v47  ;;  %v3195_v39 = vrot.slane %v2522_v14, %v3149_v51 }
 0x1e8   : > { %v643_v0 = vmul.f32 %v3170_v30, %v625_v59  ;;  %v644_v10 = vmul.f32 %v3173_v3, %v621_v17  ;;  %v569_v59 = vmul.f32 %v2974_v32, %v537_v28  ;;  %v570_v17 = vmul.f32 %v2974_v32, %v538_v23  ;;  %v2541_v28 = vld [vmem:[%s3964_s2 + $0xc] sm:$0x3] }
 0x1e9   : > { %v730_v13 = vmul.f32 %v3192_v16, %v712_v12  ;;  %v731_v26 = vmul.f32 %v3195_v39, %v708_v25  ;;  %v3219_v23 = vrot.slane %v2527_v54, %v3147_v47  ;;  %v3222_v32 = vrot.slane %v2527_v54, %v3149_v51 }
 0x1ea   : > { %v916_v1 = vpop.permute.xlu0 %915  ;;  %v1003_v2 = vpop.permute.xlu1 %1002  ;;  %v676_v14 = vmul.f32 %v2996_v38, %v643_v0  ;;  %v677_v62 = vmul.f32 %v2996_v38, %v644_v10  ;;  %v597_v10 = vadd.f32 %v2984_v36, %v569_v59  ;;  %v598_v12 = vadd.f32 %v2984_v36, %v570_v17 }
 0x1eb   : > { %v795_v25 = vsel %vm793_vm4, %v780_v15, %v788_v33  ;;  %v799_v58 = vsel %vm793_vm4, %v788_v33, %v780_v15  ;;  %v3239_v54 = vrot.slane %v2536_v50, %v3147_v47  ;;  %v3246_v36 = vrot.slane %v2541_v28, %v3147_v47 }
 0x1ec   : > { %v684_v48 = vadd.f32 %v676_v14, %v597_v10  ;;  %v685_v59 = vadd.f32 %v677_v62, %v598_v12  ;;  %v3249_v17 = vrot.slane %v2541_v28, %v3149_v51  ;;  %v763_v15 = vmul.f32 %v3004_v41, %v730_v13 }
 0x1ed   : > { %v764_v33 = vmul.f32 %v3004_v41, %v731_v26  ;;  %v817_v49 = vmul.f32 %v3219_v23, %v799_v58  ;;  %v818_v44 = vmul.f32 %v3222_v32, %v795_v25  ;;  %v923_v62 = vsel %vm921_vm5, %v3137_v19, %v916_v1 }
 0x1ee   : > { %v3179_v18 = vpop.permute.xlu0 %1089  ;;  %v3181_v24 = vpop.permute.xlu1 %1176  ;;  %v927_v14 = vsel %vm921_vm5, %v916_v1, %v3137_v19  ;;  %v1010_v41 = vsel %vm1008_vm6, %v3139_v20, %v1003_v2  ;;  %v1014_v58 = vsel %vm1008_vm6, %v1003_v2, %v3139_v20  ;;  %v771_v13 = vadd.f32 %v763_v15, %v684_v48  ;;  %v2546_v19 = vld [vmem:[%s3964_s2 + $0xe] sm:$0x3]  ;;  %v2551_v48 = vld [vmem:[%s3964_s2 + $0x10] sm:$0x3] }
 0x1ef   : > { %v772_v26 = vadd.f32 %v764_v33, %v685_v59  ;;  %v892_v28 = vmul.f32 %v3046_v52, %v2960_v29  ;;  %v891_v10 = vmul.f32 %v3046_v52, %v2942_v27  ;;  %v945_v1 = vmul.f32 %v3239_v54, %v923_v62 }
 0x1f0   : > { %v946_v12 = vmul.f32 %v3242_v55, %v927_v14  ;;  %v1032_v25 = vmul.f32 %v3246_v36, %v1010_v41  ;;  %v1033_v20 = vmul.f32 %v3249_v17, %v1014_v58  ;;  %v850_v27 = vmul.f32 %v3024_v45, %v817_v49 }
 0x1f1   : > { %v851_v52 = vmul.f32 %v3024_v45, %v818_v44  ;;  %v3293_v59 = vmul.f32 %v3048_v53, %v2980_v34  ;;  %v3297_v15 = vmul.f32 %v3048_v53, %v3010_v42  ;;  %v3301_v33 = vrot.slane %v2546_v19, %v3147_v47 }
 0x1f2   : > { %v3197_v11 = vpop.permute.xlu0 %500  ;;  %v3199_v5 = vpop.permute.xlu1 %694  ;;  %v3304_v62 = vrot.slane %v2546_v19, %v3149_v51  ;;  %v858_v49 = vadd.f32 %v850_v27, %v771_v13  ;;  %v3308_v45 = vrot.slane %v2551_v48, %v3147_v47  ;;  %v3311_v34 = vrot.slane %v2551_v48, %v3149_v51 }
 0x1f3   : > { %v859_v44 = vadd.f32 %v851_v52, %v772_v26  ;;  %v978_v42 = vmul.f32 %v3062_v56, %v945_v1  ;;  %v979_v53 = vmul.f32 %v3062_v56, %v946_v12  ;;  %v1065_v14 = vmul.f32 %v3083_v60, %v1032_v25 }
 0x1f4   : > { %4024 = vst [vmem:[#allocation21_spill] sm:$0xff] %v3308_v45  ;;  %4025 = vst [vmem:[#allocation22_spill] sm:$0xff] %v3311_v34  ;;  %v3317_v41 = vmul.f32 %v3083_v60, %v1033_v20  ;;  %v1097_v60 = vsel %vm1095_vm7, %v3141_v21, %v3179_v18  ;;  %v1101_v26 = vsel %vm1095_vm7, %v3179_v18, %v3141_v21 }
 0x1f5   : > { %v899_v12 = vadd.f32 %v891_v10, %v858_v49  ;;  %v900_v25 = vadd.f32 %v892_v28, %v859_v44  ;;  %v1188_v20 = vsel %vm1182_vm8, %v3181_v24, %v3143_v22  ;;  %v1120_v44 = vmul.f32 %v3304_v62, %v1101_v26 }
 0x1f6   : > { %v3227_v0 = vpop.permute.xlu0 %607  ;;  %v3229_v38 = vpop.permute.xlu1 %781 }
 0x1fa   : > { %v3255_v50 = vpop.permute.xlu0 %996  ;;  %v3257_v9 = vpop.permute.xlu1 %909 }
 0x1fe   : > { %v3285_v29 = vpop.permute.xlu0 %1170  ;;  %v3287_v2 = vpop.permute.xlu1 %1083 }
 0x202   : > { %v509_v58 = vpop.permute.xlu0 %508  ;;  %v703_v19 = vpop.permute.xlu1 %702 }
 0x203   : > { %v517_v13 = vsel %vm514_vm1, %v3197_v11, %v509_v58  ;;  %v521_v47 = vsel %vm514_vm1, %v509_v58, %v3197_v11  ;;  %v709_v51 = vsel %vm706_vm3, %v3199_v5, %v703_v19  ;;  %v713_v56 = vsel %vm706_vm3, %v703_v19, %v3199_v5 }
 0x204   : > { %v539_v11 = vmul.f32 %v3159_v6, %v521_v47  ;;  %v540_v1 = vmul.f32 %v3162_v7, %v517_v13  ;;  %v1184_v5 = vsel %vm1182_vm8, %v3143_v22, %v3181_v24  ;;  %v732_v21 = vmul.f32 %v3192_v16, %v713_v56 }
 0x205   : > { %v733_v27 = vmul.f32 %v3195_v39, %v709_v51  ;;  %v1119_v22 = vmul.f32 %v3301_v33, %v1097_v60  ;;  %v986_v13 = vadd.f32 %v978_v42, %v899_v12  ;;  %v1206_v47 = vmul.f32 %v3308_v45, %v1184_v5 }
 0x206   : > { %v571_v48 = vmul.f32 %v2982_v35, %v539_v11  ;;  %v572_v18 = vmul.f32 %v2982_v35, %v540_v1  ;;  %v616_v10 = vpop.permute.xlu0 %615  ;;  %v790_v28 = vpop.permute.xlu1 %789  ;;  %v765_v42 = vmul.f32 %v3016_v43, %v732_v21 }
 0x207   : > { %v622_v52 = vsel %vm619_vm2, %v3227_v0, %v616_v10  ;;  %v626_v49 = vsel %vm619_vm2, %v616_v10, %v3227_v0  ;;  %v796_v24 = vsel %vm793_vm4, %v3229_v38, %v790_v28  ;;  %v800_v35 = vsel %vm793_vm4, %v790_v28, %v3229_v38 }
 0x208   : > { %v645_v58 = vmul.f32 %v3170_v30, %v626_v49  ;;  %v646_v19 = vmul.f32 %v3173_v3, %v622_v52  ;;  %v599_v0 = vadd.f32 %v2994_v37, %v571_v48  ;;  %v600_v51 = vadd.f32 %v2994_v37, %v572_v18 }
 0x209   : > { %v819_v38 = vmul.f32 %v3219_v23, %v800_v35  ;;  %v820_v60 = vmul.f32 %v3222_v32, %v796_v24  ;;  %v987_v10 = vadd.f32 %v979_v53, %v900_v25  ;;  %v1207_v28 = vmul.f32 %v3311_v34, %v1188_v20 }
 0x20a   : > { %v678_v56 = vmul.f32 %v3002_v40, %v645_v58  ;;  %v679_v11 = vmul.f32 %v3002_v40, %v646_v19  ;;  %v1005_v26 = vpop.permute.xlu0 %1004  ;;  %v918_v1 = vpop.permute.xlu1 %917  ;;  %v766_v12 = vmul.f32 %v3016_v43, %v733_v27  ;;  %v1073_v18 = vadd.f32 %v1065_v14, %v986_v13 }
 0x20b   : > { %v1011_v37 = vsel %vm1008_vm6, %v3255_v50, %v1005_v26  ;;  %v1015_v40 = vsel %vm1008_vm6, %v1005_v26, %v3255_v50  ;;  %v1152_v52 = vmul.f32 %v3091_v63, %v1119_v22  ;;  %v924_v53 = vsel %vm921_vm5, %v3257_v9, %v918_v1 }
 0x20c   : > { %v686_v5 = vadd.f32 %v678_v56, %v599_v0  ;;  %v687_v48 = vadd.f32 %v679_v11, %v600_v51  ;;  %v928_v43 = vsel %vm921_vm5, %v918_v1, %v3257_v9  ;;  %v852_v21 = vmul.f32 %v3026_v46, %v819_v38 }
 0x20d   : > { %v853_v27 = vmul.f32 %v3026_v46, %v820_v60  ;;  %v1034_v50 = vmul.f32 %v3246_v36, %v1011_v37  ;;  %v1035_v14 = vmul.f32 %v3249_v17, %v1015_v40  ;;  %v947_v35 = vmul.f32 %v3239_v54, %v924_v53 }
 0x20e   : > { %v773_v25 = vadd.f32 %v765_v42, %v686_v5  ;;  %v774_v20 = vadd.f32 %v766_v12, %v687_v48  ;;  %v1179_v49 = vpop.permute.xlu0 %1178  ;;  %v1092_v24 = vpop.permute.xlu1 %1091  ;;  %v948_v22 = vmul.f32 %v3242_v55, %v928_v43  ;;  %v1074_v13 = vadd.f32 %v3317_v41, %v987_v10 }
 0x20f   : > { %v1185_v9 = vsel %vm1182_vm8, %v3285_v29, %v1179_v49  ;;  %v980_v46 = vmul.f32 %v3068_v57, %v947_v35  ;;  %v1189_v0 = vsel %vm1182_vm8, %v1179_v49, %v3285_v29  ;;  %v1098_v51 = vsel %vm1095_vm7, %v3287_v2, %v1092_v24 }
 0x210   : > { %v860_v58 = vadd.f32 %v852_v21, %v773_v25  ;;  %v861_v19 = vadd.f32 %v853_v27, %v774_v20  ;;  %v1102_v56 = vsel %vm1095_vm7, %v1092_v24, %v3287_v2  ;;  %v981_v41 = vmul.f32 %v3068_v57, %v948_v22  ;;  %v4026_v20 = vld [vmem:[#allocation18_spill] sm:$0xff] }
 0x211   : > { %v1121_v60 = vmul.f32 %v3301_v33, %v1098_v51  ;;  %v1153_v29 = vmul.f32 %v3091_v63, %v1120_v44  ;;  %v1067_v10 = vmul.f32 %v3085_v61, %v1034_v50  ;;  %v1068_v42 = vmul.f32 %v3085_v61, %v1035_v14 }
 0x212   : > { %v901_v11 = vadd.f32 %v3293_v59, %v860_v58  ;;  %v902_v38 = vadd.f32 %v3297_v15, %v861_v19  ;;  %v503_v26 = vpop.permute.xlu0 %502  ;;  %v697_v1 = vpop.permute.xlu1 %696  ;;  %v1122_v12 = vmul.f32 %v3304_v62, %v1102_v56  ;;  %v1208_v59 = vmul.f32 %v3308_v45, %v1185_v9 }
 0x213   : > { %v1209_v15 = vmul.f32 %v3311_v34, %v1189_v0  ;;  %v1161_v48 = vadd.f32 %v1153_v29, %v1074_v13  ;;  %v1160_v57 = vadd.f32 %v1152_v52, %v1073_v18  ;;  %v1154_v37 = vmul.f32 %v3108_v4, %v1121_v60  ;;  %v4028_v29 = vld [vmem:[#allocation9_spill] sm:$0xff] }
 0x214   : > { %v988_v5 = vadd.f32 %v980_v46, %v901_v11  ;;  %v989_v2 = vadd.f32 %v981_v41, %v902_v38  ;;  %v1155_v40 = vmul.f32 %v3108_v4, %v1122_v12  ;;  %v1239_v61 = vmul.f32 %v3118_v8, %v1206_v47  ;;  %v1253_v47 = vld [vmem:[%s3965_s3 + $0x68] sm:$0xff] }
 0x215   : > { %v1240_v25 = vmul.f32 %v3118_v8, %v1207_v28  ;;  %v1241_v21 = vmul.f32 %v4026_v20, %v1208_v59  ;;  %v1242_v49 = vmul.f32 %v4026_v20, %v1209_v15  ;;  %v4027_v13 = vmov 0.0   ;;  %v4029_v15 = vld [vmem:[#allocation11_spill] sm:$0xff] }
 0x216   : > { %v610_v53 = vpop.permute.xlu0 %609  ;;  %v3424_v63 = vpop.permute.xlu1 %998  ;;  %v1076_v44 = vadd.f32 %v1068_v42, %v989_v2  ;;  %v1075_v43 = vadd.f32 %v1067_v10, %v988_v5  ;;  %v1247_v4 = vadd.f32 %v1239_v61, %v1160_v57 }
 0x217   : > { %v1248_v50 = vadd.f32 %v1240_v25, %v1161_v48 }
 0x218   : > { %v1163_v27 = vadd.f32 %v1155_v40, %v1076_v44  ;;  %v1162_v24 = vadd.f32 %v1154_v37, %v1075_v43  ;;  %v4030_v44 = vld [vmem:[#allocation10_spill] sm:$0xff] }
 0x21a   : > { %v784_v18 = vpop.permute.xlu0 %783  ;;  %v511_v52 = vpop.permute.xlu1 %510  ;;  %v1250_v14 = vadd.f32 %v1242_v49, %v1163_v27  ;;  %v1249_v35 = vadd.f32 %v1241_v21, %v1162_v24 }
 0x21b   : > { %v518_v28 = vsel %vm514_vm1, %v503_v26, %v511_v52  ;;  %v522_v9 = vsel %vm514_vm1, %v511_v52, %v503_v26 }
 0x21c   : > { %v1255_v22 = vmul.f32 %v1250_v14, %v1248_v50  ;;  %v1254_v58 = vmul.f32 %v1249_v35, %v1247_v4  ;;  %v541_v56 = vmul.f32 %v3159_v6, %v522_v9  ;;  %v542_v11 = vmul.f32 %v3162_v7, %v518_v28  ;;  %v4032_v4 = vld [vmem:[#allocation15_spill] sm:$0xff] }
 0x21e   : > { %v912_v19 = vpop.permute.xlu0 %911  ;;  %1294 = vmatprep.subr.mxu1 %v1255_v22  ;;  %v618_v8 = vpop.permute.xlu1 %617  ;;  %v573_v10 = vmul.f32 %v4028_v29, %v541_v56  ;;  %v574_v42 = vmul.f32 %v4028_v29, %v542_v11  ;;  %v4034_v56 = vld [vmem:[#allocation16_spill] sm:$0xff] }
 0x21f   : > { %1295 = vmatpush1.msra.mxu1 %v1254_v58  ;;  %v623_v46 = vsel %vm619_vm2, %v610_v53, %v618_v8  ;;  %v627_v0 = vsel %vm619_vm2, %v618_v8, %v610_v53 }
 0x220   : > { %2556 = vmatmul.mubr.msk.f32.vlgmr.msra.gmra.mxu1 %vm394_vm0, %v1253_v47  ;;  %v647_v41 = vmul.f32 %v3170_v30, %v627_v0  ;;  %v648_v60 = vmul.f32 %v3173_v3, %v623_v46  ;;  %v601_v43 = vadd.f32 %v4030_v44, %v573_v10  ;;  %v602_v61 = vadd.f32 %v4030_v44, %v574_v42  ;;  %v4033_v0 = vld [vmem:[#allocation12_spill] sm:$0xff] }
 0x221   : > { %1408 = vmatprep.mubr.f32.mxu1 %v4027_v13  ;;  %v895_v11 = vmul.f32 %v4034_v56, %v4033_v0 }
 0x222   : > { %v1086_v51 = vpop.permute.xlu0 %1085  ;;  %v792_v38 = vpop.permute.xlu1 %791  ;;  %v680_v48 = vmul.f32 %v4029_v15, %v647_v41  ;;  %v681_v57 = vmul.f32 %v4029_v15, %v648_v60 }
 0x223   : > { %v797_v37 = vsel %vm793_vm4, %v784_v18, %v792_v38  ;;  %v801_v40 = vsel %vm793_vm4, %v792_v38, %v784_v18  ;;  %v4035_v38 = vld [vmem:[#allocation13_spill] sm:$0xff] }
 0x224   : > { %v688_v21 = vadd.f32 %v680_v48, %v601_v43  ;;  %v689_v27 = vadd.f32 %v681_v57, %v602_v61  ;;  %v821_v49 = vmul.f32 %v3219_v23, %v801_v40  ;;  %v822_v24 = vmul.f32 %v3222_v32, %v797_v37  ;;  %v4037_v40 = vld [vmem:[#allocation20_spill] sm:$0xff] }
 0x225   : > { %v896_v41 = vmul.f32 %v4034_v56, %v4035_v38  ;;  %v2518_v56 = vld [vmem:[%s3967_s5 + $0x20] sm:$0xff] }
 0x226   : > { %v705_v26 = vpop.permute.xlu0 %704  ;;  %v920_v53 = vpop.permute.xlu1 %919  ;;  %v854_v18 = vmul.f32 %v4032_v4, %v821_v49  ;;  %v855_v35 = vmul.f32 %v4032_v4, %v822_v24  ;;  %v4039_v24 = vld [vmem:[#allocation7_spill] sm:$0xff] }
 0x227   : > { %v710_v12 = vsel %vm706_vm3, %v697_v1, %v705_v26  ;;  %v714_v5 = vsel %vm706_vm3, %v705_v26, %v697_v1  ;;  %v4031_v1 = vld [vmem:[#allocation14_spill] sm:$0xff]  ;;  %v925_v22 = vsel %vm921_vm5, %v912_v19, %v920_v53  ;;  %v929_v58 = vsel %vm921_vm5, %v920_v53, %v912_v19 }
 0x228   : > { %v734_v2 = vmul.f32 %v3192_v16, %v714_v5  ;;  %v735_v59 = vmul.f32 %v3195_v39, %v710_v12  ;;  %v949_v60 = vmul.f32 %v3239_v54, %v925_v22  ;;  %v950_v26 = vmul.f32 %v3242_v55, %v929_v58 }
 0x22a   : > { %v767_v25 = vmul.f32 %v4031_v1, %v734_v2  ;;  %v768_v20 = vmul.f32 %v4031_v1, %v735_v59  ;;  %v1094_v14 = vpop.permute.xlu1 %1093  ;;  %v4036_v59 = vld [vmem:[#allocation17_spill] sm:$0xff]  ;;  %v4038_v1 = vld [vmem:[#allocation19_spill] sm:$0xff] }
 0x22b   : > { %v1099_v28 = vsel %vm1095_vm7, %v1086_v51, %v1094_v14  ;;  %v1103_v9 = vsel %vm1095_vm7, %v1094_v14, %v1086_v51  ;;  %v982_v15 = vmul.f32 %v4036_v59, %v949_v60  ;;  %v983_v48 = vmul.f32 %v4036_v59, %v950_v26  ;;  %v1785_v59 = vld [vmem:[%s3965_s3 + $0x48] sm:$0xff] }
 0x22c   : > { %v775_v52 = vadd.f32 %v767_v25, %v688_v21  ;;  %v776_v50 = vadd.f32 %v768_v20, %v689_v27  ;;  %v1123_v19 = vmul.f32 %v3301_v33, %v1099_v28  ;;  %v1124_v29 = vmul.f32 %v3304_v62, %v1103_v9 }
 0x22e   : > { %v862_v47 = vadd.f32 %v854_v18, %v775_v52  ;;  %v863_v8 = vadd.f32 %v855_v35, %v776_v50  ;;  %v1173_v12 = vpop.permute.xlu1 %1172  ;;  %v1156_v53 = vmul.f32 %v4037_v40, %v1123_v19  ;;  %v1157_v44 = vmul.f32 %v4037_v40, %v1124_v29  ;;  %v4040_v50 = vld [vmem:[#allocation8_spill] sm:$0xff]  ;;  %v4041_v29 = vld [vmem:[#allocation6_spill] sm:$0xff]  ;;  %v1701_v40 = vld [vmem:[%s3965_s3 + $0x40] sm:$0xff] }
 0x22f   : > { %v1609_v19 = vld [vmem:[%s3965_s3 + $0x38] sm:$0xff] }
 0x230   : > { %v903_v10 = vadd.f32 %v895_v11, %v862_v47  ;;  %v904_v42 = vadd.f32 %v896_v41, %v863_v8  ;;  %v299_v11 = vld [vmem:[%s3968_s6 + $0x30] sm:$0xff] }
 0x232   : > { %v990_v43 = vadd.f32 %v982_v15, %v903_v10  ;;  %v991_v61 = vadd.f32 %v983_v48, %v904_v42  ;;  %v307_v15 = vld [vmem:[%s3968_s6 + $0x70] sm:$0xff] }
 0x233   : > { %v1235_v46 = vpop.permute.xlu0 %1234  ;;  %v1517_v48 = vld [vmem:[%s3965_s3 + $0x30] sm:$0xff] }
 0x237   : > { %v1007_v5 = vpop.permute.xlu0 %1006 }
 0x238   : > { %v1012_v51 = vsel %vm1008_vm6, %v3424_v63, %v1007_v5  ;;  %v1016_v2 = vsel %vm1008_vm6, %v1007_v5, %v3424_v63 }
 0x239   : > { %v1036_v57 = vmul.f32 %v3246_v36, %v1012_v51  ;;  %v1037_v37 = vmul.f32 %v3249_v17, %v1016_v2  ;;  %v1425_v2 = vld [vmem:[%s3965_s3 + $0x28] sm:$0xff] }
 0x23b   : > { %v1069_v25 = vmul.f32 %v4038_v1, %v1036_v57  ;;  %v1070_v20 = vmul.f32 %v4038_v1, %v1037_v37  ;;  %v1181_v21 = vpop.permute.xlu0 %1180  ;;  %v377_v63 = vpop.permute.xlu1 %376  ;;  %v1969_v57 = vld [vmem:[%s3965_s3 + $0x58] sm:$0xff]  ;;  %v2523_v37 = vld [vmem:[%s3967_s5 + $0x40] sm:$0xff] }
 0x23c   : > { %v1186_v27 = vsel %vm1182_vm8, %v1173_v12, %v1181_v21  ;;  %v1190_v49 = vsel %vm1182_vm8, %v1181_v21, %v1173_v12  ;;  %v3504_v52 = vadd.f32 %v4039_v24, %v377_v63  ;;  %v3507_v14 = vadd.f32 %v4040_v50, %v377_v63  ;;  %v4042_v12 = vld [vmem:[#allocation5_spill] sm:$0xff]  ;;  %v310_v21 = vld [vmem:[%s3968_s6 + $0x88] sm:$0xff]  ;;  %v311_v63 = vld [vmem:[%s3968_s6 + $0x90] sm:$0xff] }
 0x23d   : > { %v1077_v4 = vadd.f32 %v1069_v25, %v990_v43  ;;  %v1078_v18 = vadd.f32 %v1070_v20, %v991_v61  ;;  %v1210_v35 = vmul.f32 %v3308_v45, %v1186_v27  ;;  %v1211_v22 = vmul.f32 %v3311_v34, %v1190_v49  ;;  %v2061_v43 = vld [vmem:[%s3965_s3 + $0x60] sm:$0xff]  ;;  %v312_v50 = vld [vmem:[%s3968_s6 + $0x98] sm:$0xff] }
 0x23e   : > { %504 = vrot.lane.b32.xlu0 %v3507_v14, %s2700_s19  ;;  %496 = vrot.lane.b32.xlu1 %v3504_v52, %s2700_s19  ;;  %v2528_v61 = vld [vmem:[%s3967_s5 + $0x60] sm:$0xff]  ;;  %s4045_s19 = smov 112  }
 0x23f   : > { %v1164_v58 = vadd.f32 %v1156_v53, %v1077_v4  ;;  %v1165_v47 = vadd.f32 %v1157_v44, %v1078_v18  ;;  %v1243_v8 = vmul.f32 %v1235_v46, %v1210_v35  ;;  %v1244_v28 = vmul.f32 %v1235_v46, %v1211_v22  ;;  %v3515_v9 = vpop.permute.xlu0 %1338  ;;  %v3517_v0 = vpop.permute.xlu1 %1428  ;;  %v1335_v46 = vld [vmem:[%s3965_s3 + $0x20] sm:$0xff]  ;;  %v1877_v53 = vld [vmem:[%s3965_s3 + $0x50] sm:$0xff]  ;;  %v308_v44 = vld [vmem:[%s3968_s6 + $0x78] sm:$0xff] }
 0x240   : > { %v309_v1 = vld [vmem:[%s3968_s6 + $0x80] sm:$0xff]  ;;  %v315_v18 = vld [vmem:[%s3968_s6 + $0xb0] sm:$0xff]  ;;  %v314_v35 = vld [vmem:[%s3968_s6 + $0xa8] sm:$0xff] }
 0x241   : > { %v1251_v38 = vadd.f32 %v1243_v8, %v1164_v58  ;;  %v1252_v41 = vadd.f32 %v1244_v28, %v1165_v47  ;;  %v2532_v25 = vld [vmem:[%s3967_s5 + $0x80] sm:$0xff]  ;;  %v316_v22 = vld [vmem:[%s3968_s6 + $0xb8] sm:$0xff] }
 0x242   : > { %656 = vperm.xlu0 %2627, %v2518_v56   ;;  %577 = vperm.xlu1 %2628, %v299_v11   ;;  %v2537_v20 = vld [vmem:[%s3967_s5 + $0xa0] sm:$0xff] }
 0x243   : > { %v3528_v60 = vpop.permute.xlu0 %1520  ;;  %1648 = vmatprep.subr.mxu0 %v1252_v41  ;;  %v3530_v26 = vpop.permute.xlu1 %549  ;;  %1374 = vmatprep.subr.mxu1 %v1252_v41  ;;  %v2542_v27 = vld [vmem:[%s3967_s5 + $0xc0] sm:$0xff] }
 0x244   : > { %1375 = vmatpush1.msra.mxu1 %v1251_v38  ;;  %1649 = vmatpush1.msra.mxu0 %v1251_v38  ;;  %v2547_v49 = vld [vmem:[%s3967_s5 + $0xe0] sm:$0xff] }
 0x245   : > { %2557 = vmatmul.mubr.msk.f32.vlgmr.msra.gmra.mxu1 %vm394_vm0, %v1335_v46  ;;  %1464 = vmatprep.subr.mxu1 %v1252_v41  ;;  %v2552_v24 = vld [vmem:[%s3967_s5 + $0x100] sm:$0xff] }
 0x246   : > { %2560 = vmatmul.mubr.msk.f32.vlgmr.msra.gmra.mxu0 %vm394_vm0, %v1609_v19  ;;  %1824 = vmatprep.subr.mxu0 %v1252_v41  ;;  %v313_v4 = vld [vmem:[%s3968_s6 + $0xa0] sm:$0xff] }
 0x247   : > { %1825 = vmatpush1.msra.mxu0 %v1251_v38  ;;  %1599 = vrot.lane.b32.xlu0 %v4041_v29, %s2699_s18  ;;  %v1416_v10 = vpop.permute.xlu0 %1415  ;;  %v1418_v42 = vpop.permute.xlu1 %1417 }
 0x248   : > { %1597 = vrot.lane.b32.xlu1 %v4042_v12, %s2699_s18  ;;  %1465 = vmatpush1.msra.mxu1 %v1251_v38  ;;  %v3543_v5 = vsel %vm514_vm1, %v1416_v10, %v1418_v42  ;;  %v3547_v51 = vsel %vm514_vm1, %v1418_v42, %v1416_v10 }
 0x249   : > { %2008 = vmatprep.subr.mxu0 %v1252_v41  ;;  %1556 = vmatprep.subr.mxu1 %v1252_v41 }
 0x24a   : > { %1498 = vmatprep.mubr.f32.mxu1 %v4027_v13  ;;  %1858 = vmatprep.mubr.f32.mxu0 %v4027_v13 }
 0x24b   : > { %2558 = vmatmul.mubr.msk.f32.vlgmr.msra.gmra.mxu1 %vm394_vm0, %v1425_v2  ;;  %2562 = vmatmul.mubr.msk.f32.vlgmr.msra.gmra.mxu0 %vm394_vm0, %v1785_v59  ;;  %v3685_v58 = vpop.permute.xlu0 %1505  ;;  %v3687_v47 = vpop.permute.xlu1 %1507 }
 0x24c   : > { %1557 = vmatpush1.msra.mxu1 %v1251_v38  ;;  %2009 = vmatpush1.msra.mxu0 %v1251_v38 }
 0x24d   : > { %603 = vrot.lane.b32.xlu0 %v3504_v52, %s2702_s22  ;;  %1704 = vperm.xlu1 %2628, %v307_v15  }
 0x24e   : > { %1740 = vmatprep.subr.mxu1 %v1252_v41  ;;  %1590 = vmatprep.mubr.f32.mxu1 %v4027_v13 }
 0x24f   : > { %2042 = vmatprep.mubr.f32.mxu0 %v4027_v13  ;;  %2559 = vmatmul.mubr.msk.f32.vlgmr.msra.gmra.mxu1 %vm394_vm0, %v1517_v48  ;;  %v3689_v8 = vpop.permute.xlu0 %1612 }
 0x250   : > { %1741 = vmatpush1.msra.mxu1 %v1251_v38  ;;  %2564 = vmatmul.mubr.msk.f32.vlgmr.msra.gmra.mxu0 %vm394_vm0, %v1969_v57 }
 0x251   : > { %743 = vperm.xlu0 %2627, %v2523_v37   ;;  %611 = vrot.lane.b32.xlu1 %v3507_v14, %s2702_s22  ;;  %s4043_s22 = smov 127  }
 0x252   : > { %1916 = vmatprep.subr.mxu1 %v1252_v41  ;;  %1774 = vmatprep.mubr.f32.mxu1 %v4027_v13 }
 0x253   : > { %2561 = vmatmul.mubr.msk.f32.vlgmr.msra.gmra.mxu1 %vm394_vm0, %v1701_v40  ;;  %2235 = vmatprep.mubr.f32.mxu0 %v4027_v13 }
 0x254   : > { %1917 = vmatpush1.msra.mxu1 %v1251_v38  ;;  %1950 = vmatprep.mubr.f32.mxu1 %v4027_v13 }
 0x255   : > { %1691 = vrot.lane.b32.xlu0 %v4041_v29, %s2701_s20  ;;  %1689 = vrot.lane.b32.xlu1 %v4042_v12, %s2701_s20 }
 0x256   : > { %2100 = vmatprep.subr.mxu1 %v1252_v41 }
 0x257   : > { %2563 = vmatmul.mubr.msk.f32.vlgmr.msra.gmra.mxu1 %vm394_vm0, %v1877_v53 }
 0x258   : > { %2101 = vmatpush1.msra.mxu1 %v1251_v38  ;;  %2134 = vmatprep.mubr.f32.mxu1 %v4027_v13 }
 0x259   : > { %690 = vrot.lane.b32.xlu0 %v3504_v52, %s2699_s18  ;;  %1788 = vperm.xlu1 %2628, %v308_v44  }
 0x25b   : > { %2565 = vmatmul.mubr.msk.f32.vlgmr.msra.gmra.mxu1 %vm394_vm0, %v2061_v43 }
 0x25c   : > { %2324 = vmatprep.mubr.f32.mxu1 %v4027_v13 }
 0x25d   : > { %830 = vperm.xlu0 %2627, %v2528_v61   ;;  %698 = vrot.lane.b32.xlu1 %v3507_v14, %s2699_s18  ;;  %s280_s18 = sand.u32 1, %s2687_s25  }
 0x25e   : > { %s2424_s14 = scalar_lea.sflag [#allocation3], %s280_s18 }
 0x261   : > { %777 = vrot.lane.b32.xlu0 %v3504_v52, %s2701_s20  ;;  %1880 = vperm.xlu1 %2628, %v309_v1  }
 0x265   : > { %871 = vperm.xlu0 %2627, %v2532_v25   ;;  %785 = vrot.lane.b32.xlu1 %v3507_v14, %s2701_s20 }
 0x269   : > { %1867 = vrot.lane.b32.xlu0 %v4041_v29, %s4043_s22  ;;  %1865 = vrot.lane.b32.xlu1 %v4042_v12, %s4043_s22 }
 0x26d   : > { %958 = vperm.xlu0 %2627, %v2537_v20   ;;  %1972 = vperm.xlu1 %2628, %v310_v21  }
 0x271   : > { %1959 = vrot.lane.b32.xlu0 %v4041_v29, %s4044_s13  ;;  %1957 = vrot.lane.b32.xlu1 %v4042_v12, %s4044_s13 }
 0x275   : > { %905 = vrot.lane.b32.xlu0 %v3504_v52, %s4043_s22  ;;  %2064 = vperm.xlu1 %2628, %v311_v63  }
 0x279   : > { %1045 = vperm.xlu0 %2627, %v2542_v27   ;;  %913 = vrot.lane.b32.xlu1 %v3507_v14, %s4043_s22  ;;  %s2510_s22 = sshll.u32 %s280_s18, 4 }
 0x27a   : > { %s282_s8 = scalar_lea.vmem [#allocation2], %s2510_s22 }
 0x27d   : > { %2051 = vrot.lane.b32.xlu0 %v4041_v29, %s4045_s19  ;;  %2049 = vrot.lane.b32.xlu1 %v4042_v12, %s4045_s19 }
 0x281   : > { %1000 = vrot.lane.b32.xlu0 %v3507_v14, %s4044_s13  ;;  %992 = vrot.lane.b32.xlu1 %v3504_v52, %s4044_s13 }
 0x285   : > { %2141 = vrot.lane.b32.xlu0 %v4042_v12, %s4046_s29  ;;  %1132 = vperm.xlu1 %2628, %v2547_v49  }
 0x289   : > { %1079 = vrot.lane.b32.xlu0 %v3504_v52, %s4045_s19  ;;  %2143 = vrot.lane.b32.xlu1 %v4041_v29, %s4046_s29 }
 0x28d   : > { %1219 = vperm.xlu0 %2627, %v2552_v24   ;;  %1087 = vrot.lane.b32.xlu1 %v3507_v14, %s4045_s19 }
 0x291   : > { %1166 = vrot.lane.b32.xlu0 %v3504_v52, %s4046_s29  ;;  %1258 = vperm.xlu1 %2628, %v312_v50  }
 0x295   : > { %2164 = vperm.xlu0 %2627, %v313_v4   ;;  %1174 = vrot.lane.b32.xlu1 %v3507_v14, %s4046_s29  ;;  %s2577_s29 = sshll.u32 %s2769_s28, 8  ;;  %s2707_s28 = smov [#allocation2]  }
 0x296   : > { %s2436_s21 = scalar_lea.hbm %s3969_s7, %s2577_s29  ;;  %s2639_s16 = sshll.u32 %s2707_s28, 4  ;;  %s2640_s16 = int_to_ptr.vmem [resolvable:$false] %s2639_s16 }
 0x297   : > { %s2641_s19 = scalar_lea.vmem %s2640_s16, 512 }
 0x299   : > { %2251 = vperm.xlu0 %2627, %v315_v18   ;;  %2246 = vperm.xlu1 %2628, %v314_v35  }
 0x29d   : > { %2342 = vperm.xlu1 %2628, %v316_v22  }
 0x2b0   : > { %v505_v28 = vpop.permute.xlu0 %504  ;;  %v497_v56 = vpop.permute.xlu1 %496 }
 0x2b1   : > { %v515_v11 = vsel %vm514_vm1, %v497_v56, %v505_v28  ;;  %v519_v38 = vsel %vm514_vm1, %v505_v28, %v497_v56 }
 0x2b2   : > { %v535_v41 = vmul.f32 %v3159_v6, %v519_v38  ;;  %v536_v46 = vmul.f32 %v3162_v7, %v515_v11 }
 0x2b4   : > { %v567_v19 = vmul.f32 %v3530_v26, %v535_v41  ;;  %v568_v10 = vmul.f32 %v3530_v26, %v536_v46 }
 0x2bd   : > { %v657_v42 = vpop.permute.xlu0 %656  ;;  %v578_v2 = vpop.permute.xlu1 %577 }
 0x2be   : > { %v595_v59 = vadd.f32 %v578_v2, %v567_v19  ;;  %v596_v15 = vadd.f32 %v578_v2, %v568_v10 }
 0x2c1   : > { %v1600_v48 = vpop.permute.xlu0 %1599  ;;  %v1598_v57 = vpop.permute.xlu1 %1597 }
 0x2c5   : > { %v604_v37 = vpop.permute.xlu0 %603 }
 0x2c8   : > { %v3699_v40 = vpop.permute.xlu1 %1704 }
 0x2cc   : > { %v744_v53 = vpop.permute.xlu0 %743  ;;  %v612_v44 = vpop.permute.xlu1 %611 }
 0x2cd   : > { %v620_v43 = vsel %vm619_vm2, %v604_v37, %v612_v44  ;;  %v624_v61 = vsel %vm619_vm2, %v612_v44, %v604_v37 }
 0x2ce   : > { %v641_v1 = vmul.f32 %v3170_v30, %v624_v61  ;;  %v642_v26 = vmul.f32 %v3173_v3, %v620_v43 }
 0x2d0   : > { %v674_v25 = vmul.f32 %v657_v42, %v641_v1  ;;  %v675_v20 = vmul.f32 %v657_v42, %v642_v26  ;;  %v1692_v21 = vpop.permute.xlu0 %1691  ;;  %v1690_v63 = vpop.permute.xlu1 %1689 }
 0x2d2   : > { %v682_v27 = vadd.f32 %v674_v25, %v595_v59  ;;  %v683_v49 = vadd.f32 %v675_v20, %v596_v15 }
 0x2d4   : > { %v691_v24 = vpop.permute.xlu0 %690  ;;  %v3707_v50 = vpop.permute.xlu1 %1788 }
 0x2d8   : > { %v831_v4 = vpop.permute.xlu0 %830  ;;  %v699_v18 = vpop.permute.xlu1 %698 }
 0x2d9   : > { %v711_v44 = vsel %vm706_vm3, %v699_v18, %v691_v24  ;;  %v707_v61 = vsel %vm706_vm3, %v691_v24, %v699_v18 }
 0x2da   : > { %v728_v25 = vmul.f32 %v3192_v16, %v711_v44  ;;  %v729_v34 = vmul.f32 %v3195_v39, %v707_v61  ;;  %v1509_v61 = vsel %vm619_vm2, %v3685_v58, %v3687_v47 }
 0x2dc   : > { %v778_v35 = vpop.permute.xlu0 %777  ;;  %v3709_v22 = vpop.permute.xlu1 %1880  ;;  %v761_v18 = vmul.f32 %v744_v53, %v728_v25  ;;  %v762_v29 = vmul.f32 %v744_v53, %v729_v34  ;;  %v1421_v34 = vmul.f32 %v3547_v51, %v3159_v6  ;;  %v1422_v53 = vmul.f32 %v3543_v5, %v3162_v7 }
 0x2dd   : > { %4047 = vst [vmem:[#allocation18_spill] sm:$0xff] %v3709_v22  ;;  %v1512_v6 = vmul.f32 %v1509_v61, %v3173_v3 }
 0x2e0   : > { %v872_v28 = vpop.permute.xlu0 %871  ;;  %v786_v56 = vpop.permute.xlu1 %785 }
 0x2e1   : > { %v798_v26 = vsel %vm793_vm4, %v786_v56, %v778_v35  ;;  %v794_v20 = vsel %vm793_vm4, %v778_v35, %v786_v56  ;;  %v3742_v13 = vpop.f32.mrf.mxu1  ;;  %v1510_v35 = vsel %vm619_vm2, %v3687_v47, %v3685_v58  ;;  %v1693_v47 = vsel %vm793_vm4, %v1690_v63, %v1692_v21 }
 0x2e2   : > { %4050 = vst [vmem:[#allocation10_spill] sm:$0xff] %v3742_v13  ;;  %v815_v45 = vmul.f32 %v3219_v23, %v798_v26  ;;  %v816_v24 = vmul.f32 %v3222_v32, %v794_v20  ;;  %v1602_v26 = vsel %vm706_vm3, %v1600_v48, %v1598_v57  ;;  %v769_v13 = vadd.f32 %v761_v18, %v682_v27 }
 0x2e3   : > { %v3751_v22 = vpop.f32.mrf.mxu1  ;;  %v1511_v58 = vmul.f32 %v1510_v35, %v3170_v30  ;;  %v1603_v7 = vmul.f32 %v1602_v26, %v3192_v16 }
 0x2e4   : > { %v1868_v11 = vpop.permute.xlu0 %1867  ;;  %v1866_v38 = vpop.permute.xlu1 %1865  ;;  %4052 = vst [vmem:[#allocation15_spill] sm:$0xff] %v3751_v22  ;;  %v848_v56 = vmul.f32 %v831_v4, %v815_v45  ;;  %v849_v25 = vmul.f32 %v831_v4, %v816_v24  ;;  %v1601_v45 = vsel %vm706_vm3, %v1598_v57, %v1600_v48  ;;  %v1694_v4 = vsel %vm793_vm4, %v1692_v21, %v1690_v63 }
 0x2e5   : > { %v770_v24 = vadd.f32 %v762_v29, %v683_v49  ;;  %v1869_v51 = vsel %vm921_vm5, %v1866_v38, %v1868_v11  ;;  %v1604_v30 = vmul.f32 %v1601_v45, %v3195_v39  ;;  %v1870_v18 = vsel %vm921_vm5, %v1868_v11, %v1866_v38 }
 0x2e6   : > { %v856_v5 = vadd.f32 %v848_v56, %v769_v13  ;;  %v1695_v16 = vmul.f32 %v1694_v4, %v3219_v23  ;;  %v1696_v13 = vmul.f32 %v1693_v47, %v3222_v32  ;;  %v889_v29 = vmul.f32 %v872_v28, %v3504_v52 }
 0x2e7   : > { %v857_v27 = vadd.f32 %v849_v25, %v770_v24  ;;  %v890_v39 = vmul.f32 %v872_v28, %v3507_v14  ;;  %v1871_v49 = vmul.f32 %v1869_v51, %v3239_v54  ;;  %v3801_v23 = vmul.f32 %v1870_v18, %v3242_v55 }
 0x2e8   : > { %v3711_v41 = vpop.permute.xlu0 %958  ;;  %v3713_v46 = vpop.permute.xlu1 %1972  ;;  %v3803_v32 = vadd.f32 %v889_v29, %v856_v5 }
 0x2e9   : > { %4048 = vst [vmem:[#allocation9_spill] sm:$0xff] %v3713_v46  ;;  %v3813_v61 = vadd.f32 %v890_v39, %v857_v27 }
 0x2ec   : > { %v3715_v19 = vpop.permute.xlu0 %1959  ;;  %v3717_v10 = vpop.permute.xlu1 %1957 }
 0x2ed   : > { %v1961_v11 = vsel %vm1008_vm6, %v3717_v10, %v3715_v19 }
 0x2f0   : > { %v3719_v42 = vpop.permute.xlu1 %2064  ;;  %v3721_v2 = vpop.permute.xlu0 %905 }
 0x2f1   : > { %4049 = vst [vmem:[#allocation11_spill] sm:$0xff] %v3719_v42 }
 0x2f4   : > { %v3723_v59 = vpop.permute.xlu1 %913  ;;  %v3725_v15 = vpop.permute.xlu0 %1045 }
 0x2f5   : > { %v922_v3 = vsel %vm921_vm5, %v3721_v2, %v3723_v59 }
 0x2f6   : > { %v943_v52 = vmul.f32 %v3239_v54, %v922_v3  ;;  %v1963_v54 = vmul.f32 %v1961_v11, %v3246_v36 }
 0x2f8   : > { %v3727_v37 = vpop.permute.xlu1 %2049  ;;  %v3735_v1 = vpop.permute.xlu0 %2051  ;;  %v3830_v51 = vmul.f32 %v3711_v41, %v943_v52 }
 0x2fc   : > { %v3731_v43 = vpop.permute.xlu1 %992  ;;  %v3749_v46 = vpop.permute.xlu0 %1000 }
 0x2fd   : > { %v1009_v26 = vsel %vm1008_vm6, %v3731_v43, %v3749_v46 }
 0x300   : > { %v3746_v42 = vpop.permute.xlu1 %1132  ;;  %v3780_v48 = vpop.permute.xlu0 %2141 }
 0x301   : > { %4051 = vst [vmem:[#allocation14_spill] sm:$0xff] %v3746_v42 }
 0x304   : > { %v3769_v22 = vpop.permute.xlu1 %2143  ;;  %v1080_v25 = vpop.permute.xlu0 %1079 }
 0x305   : > { %v1410_v44 = vpop.f32.mrf.mxu1 }
 0x306   : > { %v1684_v20 = vpop.f32.mrf.mxu0  ;;  %v1411_v21 = vadd.f32 %v1410_v44, %v3515_v9  ;;  %v1962_v44 = vsel %vm1008_vm6, %v3715_v19, %v3717_v10 }
 0x307   : > { %v1412_v42 = vpop.f32.mrf.mxu1  ;;  %v1685_v10 = vadd.f32 %v1684_v20, %v3689_v8  ;;  %v2054_v20 = vsel %vm1095_vm7, %v3735_v1, %v3727_v37 }
 0x308   : > { %v1686_v57 = vpop.f32.mrf.mxu0  ;;  %v1413_v38 = vadd.f32 %v1412_v42, %v3515_v9  ;;  %v3806_v56 = vpop.permute.xlu1 %1087  ;;  %v926_v9 = vsel %vm921_vm5, %v3723_v59, %v3721_v2  ;;  %v1423_v45 = vmul.f32 %v1421_v34, %v1411_v21  ;;  %v2053_v34 = vsel %vm1095_vm7, %v3727_v37, %v3735_v1 }
 0x309   : > { %v944_v59 = vmul.f32 %v3242_v55, %v926_v9  ;;  %v1013_v55 = vsel %vm1008_vm6, %v3749_v46, %v3731_v43  ;;  %v1687_v3 = vadd.f32 %v1686_v57, %v3689_v8  ;;  %v1697_v39 = vmul.f32 %v1695_v16, %v1685_v10  ;;  %v3854_v43 = vpop.permute.xlu0 %1219 }
 0x30a   : > { %v1424_v4 = vmul.f32 %v1422_v53, %v1413_v38  ;;  %v2055_v46 = vmul.f32 %v2053_v34, %v3301_v33 }
 0x30b   : > { %v1500_v63 = vpop.f32.mrf.mxu1  ;;  %v1860_v35 = vpop.f32.mrf.mxu0  ;;  %v977_v38 = vmul.f32 %v3711_v41, %v944_v59 }
 0x30c   : > { %v1501_v14 = vadd.f32 %v1500_v63, %v3517_v0  ;;  %v3846_v29 = vpop.permute.xlu1 %1258  ;;  %v1861_v11 = vadd.f32 %v1860_v35, %v3707_v50 }
 0x30d   : > { %v1502_v28 = vpop.f32.mrf.mxu1  ;;  %v1862_v5 = vpop.f32.mrf.mxu0 }
 0x30e   : > { %v1503_v42 = vadd.f32 %v1502_v28, %v3517_v0  ;;  %v1513_v47 = vmul.f32 %v1511_v58, %v1501_v14  ;;  %v1964_v0 = vmul.f32 %v1962_v44, %v3249_v17  ;;  %v1698_v28 = vmul.f32 %v1696_v13, %v1687_v3  ;;  %v4057_v3 = vld [vmem:[#allocation21_spill] sm:$0xff] }
 0x30f   : > { %v1592_v19 = vpop.f32.mrf.mxu1  ;;  %v1863_v41 = vadd.f32 %v1862_v5, %v3707_v50 }
 0x310   : > { %v1514_v24 = vmul.f32 %v1512_v6, %v1503_v42  ;;  %v1593_v2 = vadd.f32 %v1592_v19, %v3528_v60  ;;  %v1515_v27 = vadd.f32 %v1513_v47, %v1423_v45  ;;  %v1030_v6 = vmul.f32 %v3246_v36, %v1009_v26  ;;  %v2044_v37 = vpop.f32.mrf.mxu0  ;;  %v4053_v47 = vld [vmem:[#allocation6_spill] sm:$0xff]  ;;  %v1175_v50 = vpop.permute.xlu1 %1174 }
 0x311   : > { %v1594_v18 = vpop.f32.mrf.mxu1  ;;  %v2056_v36 = vmul.f32 %v2054_v20, %v3304_v62  ;;  %v1873_v42 = vmul.f32 %v1871_v49, %v1861_v11  ;;  %v4054_v19 = vld [vmem:[#allocation18_spill] sm:$0xff] }
 0x312   : > { %v1516_v53 = vadd.f32 %v1514_v24, %v1424_v4  ;;  %v1605_v58 = vmul.f32 %v1603_v7, %v1593_v2  ;;  %v1595_v21 = vadd.f32 %v1594_v18, %v3528_v60  ;;  %v1031_v60 = vmul.f32 %v3249_v17, %v1013_v55  ;;  %v2046_v26 = vpop.f32.mrf.mxu0  ;;  %v4055_v4 = vld [vmem:[#allocation9_spill] sm:$0xff]  ;;  %v1167_v18 = vpop.permute.xlu0 %1166 }
 0x313   : > { %v1776_v63 = vpop.f32.mrf.mxu1  ;;  %v1063_v14 = vmul.f32 %v3725_v15, %v1030_v6  ;;  %v2145_v17 = vsel %vm1182_vm8, %v3780_v48, %v3769_v22  ;;  %v2045_v24 = vadd.f32 %v2044_v37, %v4055_v4  ;;  %v4056_v6 = vld [vmem:[#allocation11_spill] sm:$0xff] }
 0x314   : > { %v1607_v1 = vadd.f32 %v1605_v58, %v1515_v27  ;;  %v1777_v7 = vadd.f32 %v1776_v63, %v3699_v40  ;;  %v1606_v8 = vmul.f32 %v1604_v30, %v1595_v21  ;;  %v1096_v27 = vsel %vm1095_vm7, %v1080_v25, %v3806_v56 }
 0x315   : > { %v1778_v57 = vpop.f32.mrf.mxu1  ;;  %v2147_v21 = vmul.f32 %v2145_v17, %v4057_v3  ;;  %v1117_v37 = vmul.f32 %v3301_v33, %v1096_v27  ;;  %v984_v33 = vadd.f32 %v3830_v51, %v3803_v32 }
 0x316   : > { %v1699_v52 = vadd.f32 %v1697_v39, %v1607_v1  ;;  %v1781_v16 = vmul.f32 %v1777_v7, %v4042_v12  ;;  %v1779_v35 = vadd.f32 %v1778_v57, %v3699_v40  ;;  %v1608_v44 = vadd.f32 %v1606_v8, %v1516_v53  ;;  %v4058_v39 = vld [vmem:[#allocation22_spill] sm:$0xff] }
 0x317   : > { %v1952_v9 = vpop.f32.mrf.mxu1  ;;  %v2146_v12 = vsel %vm1182_vm8, %v3769_v22, %v3780_v48  ;;  %v1100_v40 = vsel %vm1095_vm7, %v3806_v56, %v1080_v25  ;;  %v1874_v22 = vmul.f32 %v3801_v23, %v1863_v41  ;;  %v2047_v48 = vadd.f32 %v2046_v26, %v4055_v4  ;;  %v4059_v41 = vld [vmem:[#allocation14_spill] sm:$0xff] }
 0x318   : > { %v1783_v45 = vadd.f32 %v1781_v16, %v1699_v52  ;;  %v1782_v30 = vmul.f32 %v1779_v35, %v4053_v47  ;;  %v1953_v10 = vadd.f32 %v1952_v9, %v4054_v19  ;;  %v1700_v13 = vadd.f32 %v1698_v28, %v1608_v44  ;;  %v4060_v47 = vld [vmem:[#allocation15_spill] sm:$0xff] }
 0x319   : > { %v1954_v49 = vpop.f32.mrf.mxu1  ;;  %v1187_v53 = vsel %vm1182_vm8, %v1175_v50, %v1167_v18  ;;  %v1118_v63 = vmul.f32 %v3304_v62, %v1100_v40  ;;  %v1183_v56 = vsel %vm1182_vm8, %v1167_v18, %v1175_v50  ;;  %v2148_v11 = vmul.f32 %v2146_v12, %v4058_v39  ;;  %v2165_v50 = vpop.permute.xlu0 %2164 }
 0x31a   : > { %v1875_v5 = vadd.f32 %v1873_v42, %v1783_v45  ;;  %v1965_v2 = vmul.f32 %v1963_v54, %v1953_v10  ;;  %v1955_v59 = vadd.f32 %v1954_v49, %v4054_v19  ;;  %v1784_v34 = vadd.f32 %v1782_v30, %v1700_v13  ;;  %v2154_v45 = vld [vmem:[%s3966_s4] sm:$0xff]  ;;  %v4061_v19 = vld [vmem:[#allocation10_spill] sm:$0xff]  ;;  %v2247_v18 = vpop.permute.xlu1 %2246 }
 0x31b   : > { %v2136_v20 = vpop.f32.mrf.mxu1  ;;  %v2057_v1 = vmul.f32 %v2055_v46, %v2045_v24  ;;  %v1205_v8 = vmul.f32 %v4058_v39, %v1187_v53  ;;  %v2058_v57 = vmul.f32 %v2056_v36, %v2047_v48  ;;  %v1204_v62 = vmul.f32 %v4057_v3, %v1183_v56  ;;  %v2243_v24 = vld [vmem:[%s3965_s3 + $0x78] sm:$0xff]  ;;  %v2633_v56 = vld [vmem:[%s2848_s17] sm:$0xff]  ;;  %v2634_v39 = vld [vmem:[%s2848_s17 + $0x8] sm:$0xff] }
 0x31c   : > { %v1967_v58 = vadd.f32 %v1965_v2, %v1875_v5  ;;  %v1966_v55 = vmul.f32 %v1964_v0, %v1955_v59  ;;  %v2137_v54 = vadd.f32 %v2136_v20, %v4056_v6  ;;  %v1876_v25 = vadd.f32 %v1874_v22, %v1784_v34 }
 0x31d   : > { %v2138_v23 = vpop.f32.mrf.mxu1  ;;  %v1064_v0 = vmul.f32 %v3725_v15, %v1031_v60  ;;  %v985_v28 = vadd.f32 %v977_v38, %v3813_v61  ;;  %v1151_v44 = vmul.f32 %v4059_v41, %v1118_v63  ;;  %v1150_v15 = vmul.f32 %v4059_v41, %v1117_v37  ;;  %v2566_v38 = vld [vmem:[%s290_s9] ss:$0 sm:$0xff]  ;;  %v2252_v27 = vpop.permute.xlu0 %2251  ;;  %s2438_s9 = sshll.u32 %s282_s8, 4  ;;  %s2439_s9 = int_to_ptr.vmem [resolvable:$true] %s2438_s9 }
 0x31e   : > { %v2139_v7 = vadd.f32 %v2138_v23, %v4056_v6  ;;  %v1968_v52 = vadd.f32 %v1966_v55, %v1876_v25  ;;  %v2059_v31 = vadd.f32 %v2057_v1, %v1967_v58  ;;  %v2149_v16 = vmul.f32 %v2147_v21, %v2137_v54  ;;  %v2339_v6 = vld [vmem:[%s3965_s3 + $0x80] sm:$0xff]  ;;  %v2343_v54 = vpop.permute.xlu1 %2342  ;;  %s2635_s15 = scalar_lea.vmem %s2439_s9, 256  ;;  %p2642_p0 = scmp.lt.s32.totalorder %s2439_s9, %s2640_s16 }
 0x31f   : > { %v1072_v46 = vadd.f32 %v1064_v0, %v985_v28  ;;  %v1238_v36 = vmul.f32 %v3854_v43, %v1205_v8  ;;  %v1071_v42 = vadd.f32 %v1063_v14, %v984_v33  ;;  %v1237_v26 = vmul.f32 %v3854_v43, %v1204_v62  ;;  %p2636_p11 = scmp.ne.s32.totalorder %s2439_s9, %s2635_s15  ;;  %p2643_p1 = scmp.lt.s32.totalorder %s2641_s19, %s2635_s15 }
 0x320   : > { %v2150_v35 = vmul.f32 %v2148_v11, %v2139_v7  ;;  %v2060_v9 = vadd.f32 %v2058_v57, %v1968_v52  ;;  %v2151_v61 = vadd.f32 %v2149_v16, %v2059_v31  ;;  %v1333_v30 = vadd.f32 %v4060_v47, %v3846_v29 }
 0x321   : > { %v1159_v32 = vadd.f32 %v1151_v44, %v1072_v46  ;;  %v1158_v51 = vadd.f32 %v1150_v15, %v1071_v42  ;;  %v1331_v10 = vadd.f32 %v4061_v19, %v3846_v29  ;;  %v2161_v17 = vmul.f32 %v2566_v38, %v2154_v45  ;;  %v2242_v29 = vld [vmem:[%s3965_s3 + $0x70] sm:$0xff]  ;;  %p2637_p12 = pnand %p2636_p11, %p2786_p5  ;;  %p2644_p2 = por %p2643_p1, %p2642_p0 }
 0x322   : > { %v2152_v60 = vadd.f32 %v2150_v35, %v2060_v9  ;;  %v4062_v12 = vmov 0.0  }
 0x323   : > { %v1246_v14 = vadd.f32 %v1238_v36, %v1159_v32  ;;  %v1245_v43 = vadd.f32 %v1237_v26, %v1158_v51  ;;  %p2638_p13 = pneg %p2637_p12 }
 0x324   : > { %2197 = vmatprep.subr.mxu0 %v2152_v60 }
 0x325   : > { %2198 = vmatpush1.msra.mxu0 %v2151_v61  ;;  %p2645_p3 = pnand %p2644_p2, %p2638_p13 }
 0x326   : > { %2199 = vmatprep.subr.mxu0 %v1333_v30 }
 0x327   : > { %2200 = vmatpush1.msra.mxu0 %v1331_v10 }
 0x328   : > { %2201 = vmatprep.subr.mxu0 %v1246_v14 }
 0x329   : > { %2202 = vmatpush1.msra.mxu0 %v1245_v43 }
 0x32a   : > { %2567 = vmatmul.mubr.msk.f32.vlgmr.msra.gmra.mxu0 %vm2167_vm9, %v2161_v17 }
 0x32b   : > { %2412 = vmatprep.mubr.f32.mxu0 %v4062_v12 }
 0x3ea   : > { %v2237_v40 = vpop.f32.mrf.mxu0 }
 0x3eb   : > { %v2238_v4 = vadd.f32 %v2237_v40, %v2165_v50 }
 0x3ec   : > { %v2239_v13 = vpop.f32.mrf.mxu0 }
 0x3ed   : > { %v2240_v49 = vadd.f32 %v2239_v13, %v2165_v50 }
 0x3ef   : > { %2290 = vmatprep.subr.mxu1 %v2240_v49 }
 0x3f0   : > { %2291 = vmatpush1.msra.mxu1 %v2238_v4 }
 0x3f1   : > { %2568 = vmatmul.mubr.msk.f32.vlgmr.msra.gmra.mxu1 %vm394_vm0, %v2242_v29 }
 0x3f2   : > { %2330 = vmatprep.mubr.f32.mxu1 %v4062_v12 }
 0x3f5   : > { %2569 = vmatmul.mubr.msk.f32.gmra.mxu1 %vm394_vm0, %v2243_v24 }
 0x4b1   : > { %v2326_v5 = vpop.f32.mrf.mxu1 }
 0x4b2   : > { %v2327_v53 = vadd.f32 %v2326_v5, %v2247_v18 }
 0x4b3   : > { %v2328_v2 = vpop.f32.mrf.mxu1 }
 0x4b4   : > { %v2329_v34 = vadd.f32 %v2328_v2, %v2247_v18 }
 0x4b5   : > { %v2332_v59 = vpop.f32.mrf.mxu1 }
 0x4b6   : > { %v2333_v22 = vadd.f32 %v2332_v59, %v2252_v27 }
 0x4b7   : > { %v2334_v48 = vpop.f32.mrf.mxu1 }
 0x4b8   : > { %v2335_v20 = vadd.f32 %v2334_v48, %v2252_v27  ;;  %v2337_v55 = vmul.f32 %v2333_v22, %v2327_v53 }
 0x4ba   : > { %v2338_v58 = vmul.f32 %v2335_v20, %v2329_v34 }
 0x4bc   : > { %2378 = vmatprep.subr.mxu0 %v2338_v58 }
 0x4bd   : > { %2379 = vmatpush1.msra.mxu0 %v2337_v55 }
 0x4be   : > { %2570 = vmatmul.mubr.msk.f32.vlgmr.msra.gmra.mxu0 %vm394_vm0, %v2339_v6 }
 0x57e   : > { %v2414_v3 = vpop.f32.mrf.mxu0 }
 0x57f   : > { %v2415_v21 = vadd.f32 %v2414_v3, %v2343_v54 }
 0x580   : > { %v2416_v63 = vpop.f32.mrf.mxu0 }
 0x581   : > { %v2419_v25 = vadd.f32 %v2633_v56, %v2415_v21  ;;  %v2417_v23 = vadd.f32 %v2416_v63, %v2343_v54 }
 0x583   : > { %2421 = vst [vmem:[%s282_s8] sm:$0xff] %v2419_v25  ;;  %v2420_v11 = vadd.f32 %v2634_v39, %v2417_v23 }
 0x585   : > { %2422 = vst [vmem:[%s282_s8 + $0x8] sm:$0xff] %v2420_v11 }
 0x586   : > { %2648 = shalt.err (!%p2645_p3)
}
 0x587   : > { %s2649_s17 = scalar_lea.hbm %s2436_s21, 256  ;;  %s2653_s22 = scalar_lea.hbm %s3969_s7, 512 }
 0x588   : > { %p2650_p4 = scmp.ne.s32.totalorder %s2436_s21, %s2649_s17  ;;  %p2654_p9 = scmp.lt.s32.totalorder %s2436_s21, %s3969_s7 }
 0x589   : > { %p2655_p10 = scmp.lt.s32.totalorder %s2653_s22, %s2649_s17 }
 0x58a   : > { %p2651_p7 = pnand %p2650_p4, %p2786_p5 }
 0x58b   : > { %p2656_p11 = por %p2655_p10, %p2654_p9 }
 0x58c   : > { %p2652_p8 = pneg %p2651_p7 }
 0x58e   : > { %p2657_p12 = pnand %p2656_p11, %p2652_p8 }
 0x590   : > { %2660 = shalt.err (!%p2657_p12)
}
 0x591   : > { %2578 = dma.vmem_to_hbm [thread:$0]  (%p2786_p5), %s2439_s9, 256, %s2436_s21, %s2424_s14  }
 0x592 PF: > { %p2584_p13 = scmp.ge.s32.totalorder %s2695_s27, 2  ;;  %s2450_s13 = sand.u32 1, %s2683_s24  }
 0x593   : > { %s2451_s20 = scalar_lea.sflag [#allocation3], %s2450_s13 }
 0x594   : > { %p2581_p0 = pnand %p2584_p13, %p2790_p6 }
 0x596   : > { %p2582_p1 = pneg %p2581_p0 }
 0x598   : > { %2678 = dma.done.wait (%p2582_p1), %s2451_s20, 256  }
 0x599   : > { %2680 = vsyncadd (%p2582_p1), %s2451_s20, 4294967040  ;;  %p17_p2 = scmp.ge.s32.totalorder %s2773_s30, 4   ;;  %s4063_s24 = smov %s2687_s25 }
 0x59a   : > { %s4064_s25 = smov %s2691_s26  ;;  %s4065_s26 = smov %s2784_s10 }
 0x59b   : > { %s4066_s27 = smov %s2773_s30  ;;  %19 = sbr.rel (!%p17_p2) target bundleno = 3 (0x3), region = 101 }
 0x5a0   :  { %2456 = vsyncpa [#allocation3], 1 }
 0x5a1   :  { %2458 = vsyncpa [#allocation3 + $0x1], 1 }

</bundles_post_ra>
